<compile_context>
chip_gen: v6e
topology: v6e:2x2x1
jax: 0.10.0
libtpu: 0.0.40
codegen_flags: <defaults>
</compile_context>

<pallas_src>
import math

import jax
import jax.numpy as jnp
from jax.experimental import pallas as pl
from jax.experimental.pallas import tpu as pltpu

INPUT_SIZE = 10          # module default input_size
DIN_PAD = 16             # input feature dim padded for clean MXU feed
HIDDEN = 32              # hidden_size (divisible by num_heads=8), scaled down
NUM_HEADS = 8
NUM_LAYERS = 2
OUTPUT_SIZE = 1
OUT_PAD = 128            # lane-dense packed output width

# ---- weight-slab row layout (all offsets multiples of 8 sublanes) ----------
ROW_WIH0 = 0             # (DIN_PAD, 4H)   layer-0 x-projection
ROW_WHH0 = 16            # (H, 4H)         layer-0 recurrent
ROW_W1CAT = 48           # (2H, 4H)        [wih1; whh1] fused layer-1
ROW_WQ = 112             # (H, H)          scaled by 1/sqrt(head_dim)
ROW_WK = 144             # (H, H)
ROW_WV = 176             # (H, H)
ROW_WO = 208             # (H, H)
ROW_HSUM = 240           # (H, nh)         lane -> head selector
ROW_HEXP = 272           # (nh, H)         head -> lane expander
ROW_FW1 = 280            # (H, H//2)
ROW_FW2 = 312            # (H//2, 128)     fc2 weights lane-placed at lane H
W_SLAB_ROWS = 328
B_SLAB_ROWS = 8          # b0 | b1 | bq | bk | bv | bo | fb1 | fb2(lane H)


# ---------------------------------------------------------------------------
# Fused forward kernel
# ---------------------------------------------------------------------------
def _make_kernel(T, Bk):
    H = HIDDEN
    nh = NUM_HEADS
    f32 = jnp.float32
    bf16 = jnp.bfloat16

    def kernel(x_ref, w_ref, b_ref, out_ref, gx_scr, seq_scr):
        # ---- carve packed slabs (static slices, loaded once) --------------
        wih0 = w_ref[ROW_WIH0:ROW_WIH0 + DIN_PAD, :]              # (16, 4H)
        whh0 = w_ref[ROW_WHH0:ROW_WHH0 + H, :].astype(bf16)       # (H, 4H)
        w1cat = w_ref[ROW_W1CAT:ROW_W1CAT + 2 * H, :].astype(bf16)  # (2H, 4H)
        wq = w_ref[ROW_WQ:ROW_WQ + H, :H]
        wk = w_ref[ROW_WK:ROW_WK + H, :H]
        wv = w_ref[ROW_WV:ROW_WV + H, :H]
        wo = w_ref[ROW_WO:ROW_WO + H, :H]
        hsum = w_ref[ROW_HSUM:ROW_HSUM + H, :nh]
        hexp = w_ref[ROW_HEXP:ROW_HEXP + nh, :H]
        fw1 = w_ref[ROW_FW1:ROW_FW1 + H, :H // 2]
        fw2 = w_ref[ROW_FW2:ROW_FW2 + H // 2, :]                  # (16, 128)

        b0 = b_ref[0:1, :]
        b1 = b_ref[1:2, :]
        bq = b_ref[2:3, :H]
        bk_ = b_ref[3:4, :H]
        bv = b_ref[4:5, :H]
        bo = b_ref[5:6, :H]
        fb1 = b_ref[6:7, :H // 2]
        fb2 = b_ref[7:8, :]                                       # (1, 128)

        # ---- layer-0 input projection hoisted out of the recurrence -------
        gx_scr[...] = jnp.dot(x_ref[...], wih0,
                              preferred_element_type=f32) + b0    # (T*Bk, 4H)

        # ---- interleaved 2-layer LSTM recurrence (1-step skew) ------------
        # iteration t: layer-0 step t  (uses h0[t-1])
        #              layer-1 step t-1 (uses h0[t-1], h1[t-2])
        # Gate lane order is [ i | f | o | g ] (pre-permuted host-side).
        zero = jnp.zeros((Bk, H), f32)
        h0, c0, h1, c1 = zero, zero, zero, zero
        for t in range(T + 1):
            if t >= 1:                                 # layer-1 gate matmul
                if t == 1:                             # h1[-1] == 0
                    g1 = jnp.dot(h0.astype(bf16), w1cat[:H, :],
                                 preferred_element_type=f32) + b1
                else:
                    lhs1 = jnp.concatenate([h0, h1], axis=-1).astype(bf16)
                    g1 = jnp.dot(lhs1, w1cat,
                                 preferred_element_type=f32) + b1
            if t < T:                                  # layer-0 step t
                g0 = gx_scr[t * Bk:(t + 1) * Bk, :]
                if t > 0:                              # h0[-1] == 0
                    g0 = g0 + jnp.dot(h0.astype(bf16), whh0,
                                      preferred_element_type=f32)
                s0 = jax.nn.sigmoid(g0[:, :3 * H])     # [ i | f | o ]
                gg0 = jnp.tanh(g0[:, 3 * H:])
                c0 = s0[:, H:2 * H] * c0 + s0[:, :H] * gg0
                h0_next = s0[:, 2 * H:3 * H] * jnp.tanh(c0)
            if t >= 1:                                 # layer-1 step t-1
                s1 = jax.nn.sigmoid(g1[:, :3 * H])
                gg1 = jnp.tanh(g1[:, 3 * H:])
                c1 = s1[:, H:2 * H] * c1 + s1[:, :H] * gg1
                h1 = s1[:, 2 * H:3 * H] * jnp.tanh(c1)
                seq_scr[(t - 1) * Bk:t * Bk, :] = h1
            if t < T:
                h0 = h0_next

        # ---- multi-head self-attention, last query only --------------------
        # Valid because the module only consumes attn_out[:, -1, :].
        seq = seq_scr[...]                                        # (T*Bk, H)
        q = jnp.dot(h1, wq, preferred_element_type=f32) + bq      # scaled
        k = jnp.dot(seq, wk, preferred_element_type=f32) + bk_
        v = jnp.dot(seq, wv, preferred_element_type=f32) + bv
        q_t = jnp.concatenate([q] * T, axis=0)                    # (T*Bk, H)
        scores = jnp.dot(q_t * k, hsum,
                         preferred_element_type=f32)              # (T*Bk, nh)
        s3 = scores.reshape(T, Bk, nh)                            # aligned: Bk=8
        m = jnp.max(s3, axis=0, keepdims=True)
        e = jnp.exp(s3 - m)
        p = (e / jnp.sum(e, axis=0, keepdims=True)).reshape(T * Bk, nh)
        pf = jnp.dot(p, hexp, preferred_element_type=f32)         # (T*Bk, H)
        ctx = jnp.sum((pf * v).reshape(T, Bk, H), axis=0)         # (Bk, H)
        feat = jnp.dot(ctx, wo, preferred_element_type=f32) + bo  # (Bk, H)

        # ---- FC head (dropouts are identity at inference) ------------------
        hfc = jnp.maximum(
            jnp.dot(feat, fw1, preferred_element_type=f32) + fb1, 0.0)
        # fc2 weights/bias are lane-placed at lane H -> prediction lands at
        # lane H, all other lanes zero: packed row straight off the MXU.
        pred_row = jnp.dot(hfc, fw2, preferred_element_type=f32) + fb2

        out_ref[...] = pred_row            # prediction at lane H, zeros else
        out_ref[:, :H] = feat              # features at lanes [0, H)

    return kernel


# ---------------------------------------------------------------------------
# Wrapper (matches LSTMPricePredictor.forward in eval mode)
# ---------------------------------------------------------------------------
def lstm_price_predictor_forward(x, w_slab, b_slab):
    """x: (B, T, input_size) batch-first, like the PyTorch module."""
    B, T, din = x.shape
    H = HIDDEN
    Bk = ((B + 7) // 8) * 8            # pad batch to fill vreg sublanes

    # time-major, batch- and feature-pad, flatten -> (T*Bk, DIN_PAD) in XLA
    x_tm = jnp.transpose(x, (1, 0, 2))
    x_tm = jnp.pad(x_tm, ((0, 0), (0, Bk - B), (0, DIN_PAD - din)))
    x_flat = x_tm.reshape(T * Bk, DIN_PAD)

    packed = pl.pallas_call(
        _make_kernel(T, Bk),
        out_shape=jax.ShapeDtypeStruct((Bk, OUT_PAD), jnp.float32),
        scratch_shapes=[pltpu.VMEM((T * Bk, 4 * H), jnp.float32),  # gate proj
                        pltpu.VMEM((T * Bk, H), jnp.float32)],     # layer-1 seq
        # Grid-less fused kernel: the whole problem is VMEM-resident on
        # v5e / v6e / v7x; only 3 operand DMAs (x + 2 slabs).
    )(x_flat, w_slab, b_slab)

    features = packed[:B, :H]
    prediction = packed[:B, H:H + OUTPUT_SIZE]
    return prediction, features


# ---------------------------------------------------------------------------
# Parameter construction: PyTorch-layout init, then one-time host-side
# conversion into the two packed kernel slabs.
# ---------------------------------------------------------------------------
def init_torch_params(key):
    H = HIDDEN
    keys = jax.random.split(key, 16)

    def u(kk, shape, bound):
        return jax.random.uniform(kk, shape, jnp.float32, -bound, bound)

    p, idx, din = {}, 0, INPUT_SIZE
    k_lstm = 1.0 / math.sqrt(H)
    for layer in range(NUM_LAYERS):
        p[f'w_ih_l{layer}'] = u(keys[idx], (4 * H, din), k_lstm); idx += 1
        p[f'w_hh_l{layer}'] = u(keys[idx], (4 * H, H), k_lstm);   idx += 1
        p[f'b_ih_l{layer}'] = u(keys[idx], (4 * H,), k_lstm);     idx += 1
        p[f'b_hh_l{layer}'] = u(keys[idx], (4 * H,), k_lstm);     idx += 1
        din = H

    p['in_proj_w'] = u(keys[idx], (3 * H, H), math.sqrt(6.0 / (4 * H))); idx += 1
    p['in_proj_b'] = jnp.zeros((3 * H,), jnp.float32)
    p['out_proj_w'] = u(keys[idx], (H, H), 1.0 / math.sqrt(H)); idx += 1
    p['out_proj_b'] = jnp.zeros((H,), jnp.float32)

    k_fc1 = 1.0 / math.sqrt(H)
    p['fc1_w'] = u(keys[idx], (H // 2, H), k_fc1); idx += 1
    p['fc1_b'] = u(keys[idx], (H // 2,), k_fc1);   idx += 1
    k_fc2 = 1.0 / math.sqrt(H // 2)
    p['fc2_w'] = u(keys[idx], (OUTPUT_SIZE, H // 2), k_fc2); idx += 1
    p['fc2_b'] = u(keys[idx], (OUTPUT_SIZE,), k_fc2);        idx += 1
    return p


def prepare_params(p):
    """PyTorch layout -> two packed kernel slabs (run once, host-side).

    * LSTM gate rows reordered [i,f,g,o] -> [i,f,o,g], weights transposed to
      (K, 4H), b_ih + b_hh fused; layer-1 wih/whh concatenated for the fused
      [h0 | h1] matmul.
    * 1/sqrt(head_dim) folded into wq / bq.
    * fc2 weights/bias lane-placed at lane H so the kernel's last matmul
      emits the packed output row directly.
    """
    H, nh = HIDDEN, NUM_HEADS
    hd = H // nh
    scale = 1.0 / math.sqrt(hd)

    def reorder(w):                  # rows [i, f, g, o] -> [i, f, o, g]
        i, f, g, o = w[:H], w[H:2 * H], w[2 * H:3 * H], w[3 * H:]
        return jnp.concatenate([i, f, o, g], axis=0)

    def put(slab, row, block):
        kk, nn = block.shape
        return slab.at[row:row + kk, :nn].set(block)

    w_slab = jnp.zeros((W_SLAB_ROWS, 128), jnp.float32)
    b_slab = jnp.zeros((B_SLAB_ROWS, 128), jnp.float32)

    wih0 = reorder(p['w_ih_l0']).T                               # (Din, 4H)
    wih0 = jnp.pad(wih0, ((0, DIN_PAD - wih0.shape[0]), (0, 0)))
    w_slab = put(w_slab, ROW_WIH0, wih0)
    w_slab = put(w_slab, ROW_WHH0, reorder(p['w_hh_l0']).T)
    w1cat = jnp.concatenate([reorder(p['w_ih_l1']).T,
                             reorder(p['w_hh_l1']).T], axis=0)   # (2H, 4H)
    w_slab = put(w_slab, ROW_W1CAT, w1cat)

    w_slab = put(w_slab, ROW_WQ, p['in_proj_w'][:H].T * scale)
    w_slab = put(w_slab, ROW_WK, p['in_proj_w'][H:2 * H].T)
    w_slab = put(w_slab, ROW_WV, p['in_proj_w'][2 * H:3 * H].T)
    w_slab = put(w_slab, ROW_WO, p['out_proj_w'].T)

    lane = jnp.arange(H)
    head = jnp.arange(nh)
    sel = (lane[:, None] // hd == head[None, :]).astype(jnp.float32)  # (H, nh)
    w_slab = put(w_slab, ROW_HSUM, sel)
    w_slab = put(w_slab, ROW_HEXP, sel.T)

    w_slab = put(w_slab, ROW_FW1, p['fc1_w'].T)
    fw2 = jnp.zeros((H // 2, 128), jnp.float32).at[:, H].set(p['fc2_w'][0])
    w_slab = put(w_slab, ROW_FW2, fw2)

    b_slab = b_slab.at[0, :].set(reorder(p['b_ih_l0'] + p['b_hh_l0']))
    b_slab = b_slab.at[1, :].set(reorder(p['b_ih_l1'] + p['b_hh_l1']))
    b_slab = b_slab.at[2, :H].set(p['in_proj_b'][:H] * scale)
    b_slab = b_slab.at[3, :H].set(p['in_proj_b'][H:2 * H])
    b_slab = b_slab.at[4, :H].set(p['in_proj_b'][2 * H:3 * H])
    b_slab = b_slab.at[5, :H].set(p['out_proj_b'])
    b_slab = b_slab.at[6, :H // 2].set(p['fc1_b'])
    b_slab = b_slab.at[7, H].set(p['fc2_b'][0])
    return w_slab, b_slab


if __name__ == "__main__":
    key = jax.random.PRNGKey(0)
    kx, kparam = jax.random.split(key)
    B, T = 2, 8                                   # batch=2, sequence=8
    x = jax.random.normal(kx, (B, T, INPUT_SIZE), jnp.float32)
    w_slab, b_slab = prepare_params(init_torch_params(kparam))

    fwd = jax.jit(lstm_price_predictor_forward)
    prediction, features = fwd(x, w_slab, b_slab)
    jax.block_until_ready((prediction, features))

    assert prediction.shape == (B, OUTPUT_SIZE)
    assert features.shape == (B, HIDDEN)
    assert bool(jnp.all(jnp.isfinite(prediction)))
    assert bool(jnp.all(jnp.isfinite(features)))
    print("KERNEL_OK")
</pallas_src>

<mosaic_0001>
module attributes {stable_mosaic.version = 11 : i64} {
  func.func @kernel(%arg0: memref<64x16xf32, #tpu.memory_space<vmem>>, %arg1: memref<328x128xf32, #tpu.memory_space<vmem>>, %arg2: memref<8x128xf32, #tpu.memory_space<vmem>>, %arg3: memref<8x128xf32, #tpu.memory_space<vmem>>, %arg4: memref<64x128xf32, #tpu.memory_space<vmem>>, %arg5: memref<64x32xf32, #tpu.memory_space<vmem>>) attributes {dimension_semantics = [], scalar_prefetch = 0 : i64, scratch_operands = 2 : i64, tpu.core_type = #tpu.core_type<tc>} {
    %c0 = arith.constant 0 : index
    %c0_0 = arith.constant 0 : index
    %0 = vector.load %arg1[%c0, %c0_0] : memref<328x128xf32, #tpu.memory_space<vmem>>, vector<16x128xf32>
    %c16 = arith.constant 16 : index
    %c0_1 = arith.constant 0 : index
    %1 = vector.load %arg1[%c16, %c0_1] : memref<328x128xf32, #tpu.memory_space<vmem>>, vector<32x128xf32>
    %2 = arith.truncf %1 : vector<32x128xf32> to vector<32x128xbf16>
    %c48 = arith.constant 48 : index
    %c0_2 = arith.constant 0 : index
    %3 = vector.load %arg1[%c48, %c0_2] : memref<328x128xf32, #tpu.memory_space<vmem>>, vector<64x128xf32>
    %4 = arith.truncf %3 : vector<64x128xf32> to vector<64x128xbf16>
    %c112 = arith.constant 112 : index
    %c0_3 = arith.constant 0 : index
    %5 = vector.load %arg1[%c112, %c0_3] : memref<328x128xf32, #tpu.memory_space<vmem>>, vector<32x32xf32>
    %c144 = arith.constant 144 : index
    %c0_4 = arith.constant 0 : index
    %6 = vector.load %arg1[%c144, %c0_4] : memref<328x128xf32, #tpu.memory_space<vmem>>, vector<32x32xf32>
    %c176 = arith.constant 176 : index
    %c0_5 = arith.constant 0 : index
    %7 = vector.load %arg1[%c176, %c0_5] : memref<328x128xf32, #tpu.memory_space<vmem>>, vector<32x32xf32>
    %c208 = arith.constant 208 : index
    %c0_6 = arith.constant 0 : index
    %8 = vector.load %arg1[%c208, %c0_6] : memref<328x128xf32, #tpu.memory_space<vmem>>, vector<32x32xf32>
    %c240 = arith.constant 240 : index
    %c0_7 = arith.constant 0 : index
    %9 = vector.load %arg1[%c240, %c0_7] : memref<328x128xf32, #tpu.memory_space<vmem>>, vector<32x8xf32>
    %c272 = arith.constant 272 : index
    %c0_8 = arith.constant 0 : index
    %10 = vector.load %arg1[%c272, %c0_8] : memref<328x128xf32, #tpu.memory_space<vmem>>, vector<8x32xf32>
    %c280 = arith.constant 280 : index
    %c0_9 = arith.constant 0 : index
    %11 = vector.load %arg1[%c280, %c0_9] : memref<328x128xf32, #tpu.memory_space<vmem>>, vector<32x16xf32>
    %c312 = arith.constant 312 : index
    %c0_10 = arith.constant 0 : index
    %12 = vector.load %arg1[%c312, %c0_10] : memref<328x128xf32, #tpu.memory_space<vmem>>, vector<16x128xf32>
    %c0_11 = arith.constant 0 : index
    %c0_12 = arith.constant 0 : index
    %13 = vector.load %arg2[%c0_11, %c0_12] : memref<8x128xf32, #tpu.memory_space<vmem>>, vector<1x128xf32>
    %c1 = arith.constant 1 : index
    %c0_13 = arith.constant 0 : index
    %14 = vector.load %arg2[%c1, %c0_13] : memref<8x128xf32, #tpu.memory_space<vmem>>, vector<1x128xf32>
    %c2 = arith.constant 2 : index
    %c0_14 = arith.constant 0 : index
    %15 = vector.load %arg2[%c2, %c0_14] : memref<8x128xf32, #tpu.memory_space<vmem>>, vector<1x32xf32>
    %c3 = arith.constant 3 : index
    %c0_15 = arith.constant 0 : index
    %16 = vector.load %arg2[%c3, %c0_15] : memref<8x128xf32, #tpu.memory_space<vmem>>, vector<1x32xf32>
    %c4 = arith.constant 4 : index
    %c0_16 = arith.constant 0 : index
    %17 = vector.load %arg2[%c4, %c0_16] : memref<8x128xf32, #tpu.memory_space<vmem>>, vector<1x32xf32>
    %c5 = arith.constant 5 : index
    %c0_17 = arith.constant 0 : index
    %18 = vector.load %arg2[%c5, %c0_17] : memref<8x128xf32, #tpu.memory_space<vmem>>, vector<1x32xf32>
    %c6 = arith.constant 6 : index
    %c0_18 = arith.constant 0 : index
    %19 = vector.load %arg2[%c6, %c0_18] : memref<8x128xf32, #tpu.memory_space<vmem>>, vector<1x16xf32>
    %c7 = arith.constant 7 : index
    %c0_19 = arith.constant 0 : index
    %20 = vector.load %arg2[%c7, %c0_19] : memref<8x128xf32, #tpu.memory_space<vmem>>, vector<1x128xf32>
    %c0_20 = arith.constant 0 : index
    %c0_21 = arith.constant 0 : index
    %21 = vector.load %arg0[%c0_20, %c0_21] : memref<64x16xf32, #tpu.memory_space<vmem>>, vector<64x16xf32>
    %cst = arith.constant dense<0.000000e+00> : vector<64x128xf32>
    %22 = tpu.matmul %21, %0, %cst {dimension_numbers = #tpu.dot_dimension_numbers<[1], [0], [0], [1], [0, 0, 1, 1], [], []>} : vector<64x16xf32>, vector<16x128xf32>, vector<64x128xf32> -> vector<64x128xf32>
    %23 = vector.broadcast %13 : vector<1x128xf32> to vector<64x128xf32>
    %24 = arith.addf %22, %23 : vector<64x128xf32>
    %c0_22 = arith.constant 0 : index
    %c0_23 = arith.constant 0 : index
    %25 = vector.load %arg4[%c0_22, %c0_23] : memref<64x128xf32, #tpu.memory_space<vmem>>, vector<64x128xf32>
    tpu.vector_store %arg4[%c0_22, %c0_23], %24 {strides = array<i32>} : memref<64x128xf32, #tpu.memory_space<vmem>>, vector<64x128xf32>,
    %cst_24 = arith.constant 0.000000e+00 : f32
    %26 = vector.broadcast %cst_24 : f32 to vector<8x32xf32>
    %c0_25 = arith.constant 0 : index
    %c0_26 = arith.constant 0 : index
    %27 = vector.load %arg4[%c0_25, %c0_26] : memref<64x128xf32, #tpu.memory_space<vmem>>, vector<8x128xf32>
    %28 = vector.extract_strided_slice %27 {offsets = [0, 0], sizes = [8, 96], strides = [1, 1]} : vector<8x128xf32> to vector<8x96xf32>
    %29 = arith.negf %28 : vector<8x96xf32>
    %30 = math.exp %29 : vector<8x96xf32>
    %cst_27 = arith.constant 1.000000e+00 : f32
    %31 = vector.broadcast %cst_27 : f32 to vector<8x96xf32>
    %32 = arith.addf %31, %30 : vector<8x96xf32>
    %33 = arith.divf %31, %32 : vector<8x96xf32>
    %34 = vector.extract_strided_slice %27 {offsets = [0, 96], sizes = [8, 32], strides = [1, 1]} : vector<8x128xf32> to vector<8x32xf32>
    %35 = math.tanh %34 : vector<8x32xf32>
    %36 = vector.extract_strided_slice %33 {offsets = [0, 32], sizes = [8, 32], strides = [1, 1]} : vector<8x96xf32> to vector<8x32xf32>
    %37 = arith.mulf %36, %26 : vector<8x32xf32>
    %38 = vector.extract_strided_slice %33 {offsets = [0, 0], sizes = [8, 32], strides = [1, 1]} : vector<8x96xf32> to vector<8x32xf32>
    %39 = arith.mulf %38, %35 : vector<8x32xf32>
    %40 = arith.addf %37, %39 : vector<8x32xf32>
    %41 = vector.extract_strided_slice %33 {offsets = [0, 64], sizes = [8, 32], strides = [1, 1]} : vector<8x96xf32> to vector<8x32xf32>
    %42 = math.tanh %40 : vector<8x32xf32>
    %43 = arith.mulf %41, %42 : vector<8x32xf32>
    %44 = arith.truncf %43 : vector<8x32xf32> to vector<8x32xbf16>
    %45 = vector.extract_strided_slice %4 {offsets = [0, 0], sizes = [32, 128], strides = [1, 1]} : vector<64x128xbf16> to vector<32x128xbf16>
    %cst_28 = arith.constant dense<0.000000e+00> : vector<8x128xf32>
    %46 = tpu.matmul %44, %45, %cst_28 {dimension_numbers = #tpu.dot_dimension_numbers<[1], [0], [0], [1], [0, 0, 1, 1], [], []>} : vector<8x32xbf16>, vector<32x128xbf16>, vector<8x128xf32> -> vector<8x128xf32>
    %47 = vector.broadcast %14 : vector<1x128xf32> to vector<8x128xf32>
    %48 = arith.addf %46, %47 : vector<8x128xf32>
    %c8 = arith.constant 8 : index
    %c0_29 = arith.constant 0 : index
    %49 = vector.load %arg4[%c8, %c0_29] : memref<64x128xf32, #tpu.memory_space<vmem>>, vector<8x128xf32>
    %50 = arith.truncf %43 : vector<8x32xf32> to vector<8x32xbf16>
    %cst_30 = arith.constant dense<0.000000e+00> : vector<8x128xf32>
    %51 = tpu.matmul %50, %2, %cst_30 {dimension_numbers = #tpu.dot_dimension_numbers<[1], [0], [0], [1], [0, 0, 1, 1], [], []>} : vector<8x32xbf16>, vector<32x128xbf16>, vector<8x128xf32> -> vector<8x128xf32>
    %52 = arith.addf %49, %51 : vector<8x128xf32>
    %53 = vector.extract_strided_slice %52 {offsets = [0, 0], sizes = [8, 96], strides = [1, 1]} : vector<8x128xf32> to vector<8x96xf32>
    %54 = arith.negf %53 : vector<8x96xf32>
    %55 = math.exp %54 : vector<8x96xf32>
    %cst_31 = arith.constant 1.000000e+00 : f32
    %56 = vector.broadcast %cst_31 : f32 to vector<8x96xf32>
    %57 = arith.addf %56, %55 : vector<8x96xf32>
    %58 = arith.divf %56, %57 : vector<8x96xf32>
    %59 = vector.extract_strided_slice %52 {offsets = [0, 96], sizes = [8, 32], strides = [1, 1]} : vector<8x128xf32> to vector<8x32xf32>
    %60 = math.tanh %59 : vector<8x32xf32>
    %61 = vector.extract_strided_slice %58 {offsets = [0, 32], sizes = [8, 32], strides = [1, 1]} : vector<8x96xf32> to vector<8x32xf32>
    %62 = arith.mulf %61, %40 : vector<8x32xf32>
    %63 = vector.extract_strided_slice %58 {offsets = [0, 0], sizes = [8, 32], strides = [1, 1]} : vector<8x96xf32> to vector<8x32xf32>
    %64 = arith.mulf %63, %60 : vector<8x32xf32>
    %65 = arith.addf %62, %64 : vector<8x32xf32>
    %66 = vector.extract_strided_slice %58 {offsets = [0, 64], sizes = [8, 32], strides = [1, 1]} : vector<8x96xf32> to vector<8x32xf32>
    %67 = math.tanh %65 : vector<8x32xf32>
    %68 = arith.mulf %66, %67 : vector<8x32xf32>
    %69 = vector.extract_strided_slice %48 {offsets = [0, 0], sizes = [8, 96], strides = [1, 1]} : vector<8x128xf32> to vector<8x96xf32>
    %70 = arith.negf %69 : vector<8x96xf32>
    %71 = math.exp %70 : vector<8x96xf32>
    %cst_32 = arith.constant 1.000000e+00 : f32
    %72 = vector.broadcast %cst_32 : f32 to vector<8x96xf32>
    %73 = arith.addf %72, %71 : vector<8x96xf32>
    %74 = arith.divf %72, %73 : vector<8x96xf32>
    %75 = vector.extract_strided_slice %48 {offsets = [0, 96], sizes = [8, 32], strides = [1, 1]} : vector<8x128xf32> to vector<8x32xf32>
    %76 = math.tanh %75 : vector<8x32xf32>
    %77 = vector.extract_strided_slice %74 {offsets = [0, 32], sizes = [8, 32], strides = [1, 1]} : vector<8x96xf32> to vector<8x32xf32>
    %78 = arith.mulf %77, %26 : vector<8x32xf32>
    %79 = vector.extract_strided_slice %74 {offsets = [0, 0], sizes = [8, 32], strides = [1, 1]} : vector<8x96xf32> to vector<8x32xf32>
    %80 = arith.mulf %79, %76 : vector<8x32xf32>
    %81 = arith.addf %78, %80 : vector<8x32xf32>
    %82 = vector.extract_strided_slice %74 {offsets = [0, 64], sizes = [8, 32], strides = [1, 1]} : vector<8x96xf32> to vector<8x32xf32>
    %83 = math.tanh %81 : vector<8x32xf32>
    %84 = arith.mulf %82, %83 : vector<8x32xf32>
    %c0_33 = arith.constant 0 : index
    %c0_34 = arith.constant 0 : index
    %85 = vector.load %arg5[%c0_33, %c0_34] : memref<64x32xf32, #tpu.memory_space<vmem>>, vector<8x32xf32>
    tpu.vector_store %arg5[%c0_33, %c0_34], %84 {strides = array<i32>} : memref<64x32xf32, #tpu.memory_space<vmem>>, vector<8x32xf32>,
    %86 = tpu.concatenate %68, %84 in 1 : vector<8x32xf32>, vector<8x32xf32> -> vector<8x64xf32>
    %87 = arith.truncf %86 : vector<8x64xf32> to vector<8x64xbf16>
    %cst_35 = arith.constant dense<0.000000e+00> : vector<8x128xf32>
    %88 = tpu.matmul %87, %4, %cst_35 {dimension_numbers = #tpu.dot_dimension_numbers<[1], [0], [0], [1], [0, 0, 1, 1], [], []>} : vector<8x64xbf16>, vector<64x128xbf16>, vector<8x128xf32> -> vector<8x128xf32>
    %89 = vector.broadcast %14 : vector<1x128xf32> to vector<8x128xf32>
    %90 = arith.addf %88, %89 : vector<8x128xf32>
    %c16_36 = arith.constant 16 : index
    %c0_37 = arith.constant 0 : index
    %91 = vector.load %arg4[%c16_36, %c0_37] : memref<64x128xf32, #tpu.memory_space<vmem>>, vector<8x128xf32>
    %92 = arith.truncf %68 : vector<8x32xf32> to vector<8x32xbf16>
    %cst_38 = arith.constant dense<0.000000e+00> : vector<8x128xf32>
    %93 = tpu.matmul %92, %2, %cst_38 {dimension_numbers = #tpu.dot_dimension_numbers<[1], [0], [0], [1], [0, 0, 1, 1], [], []>} : vector<8x32xbf16>, vector<32x128xbf16>, vector<8x128xf32> -> vector<8x128xf32>
    %94 = arith.addf %91, %93 : vector<8x128xf32>
    %95 = vector.extract_strided_slice %94 {offsets = [0, 0], sizes = [8, 96], strides = [1, 1]} : vector<8x128xf32> to vector<8x96xf32>
    %96 = arith.negf %95 : vector<8x96xf32>
    %97 = math.exp %96 : vector<8x96xf32>
    %cst_39 = arith.constant 1.000000e+00 : f32
    %98 = vector.broadcast %cst_39 : f32 to vector<8x96xf32>
    %99 = arith.addf %98, %97 : vector<8x96xf32>
    %100 = arith.divf %98, %99 : vector<8x96xf32>
    %101 = vector.extract_strided_slice %94 {offsets = [0, 96], sizes = [8, 32], strides = [1, 1]} : vector<8x128xf32> to vector<8x32xf32>
    %102 = math.tanh %101 : vector<8x32xf32>
    %103 = vector.extract_strided_slice %100 {offsets = [0, 32], sizes = [8, 32], strides = [1, 1]} : vector<8x96xf32> to vector<8x32xf32>
    %104 = arith.mulf %103, %65 : vector<8x32xf32>
    %105 = vector.extract_strided_slice %100 {offsets = [0, 0], sizes = [8, 32], strides = [1, 1]} : vector<8x96xf32> to vector<8x32xf32>
    %106 = arith.mulf %105, %102 : vector<8x32xf32>
    %107 = arith.addf %104, %106 : vector<8x32xf32>
    %108 = vector.extract_strided_slice %100 {offsets = [0, 64], sizes = [8, 32], strides = [1, 1]} : vector<8x96xf32> to vector<8x32xf32>
    %109 = math.tanh %107 : vector<8x32xf32>
    %110 = arith.mulf %108, %109 : vector<8x32xf32>
    %111 = vector.extract_strided_slice %90 {offsets = [0, 0], sizes = [8, 96], strides = [1, 1]} : vector<8x128xf32> to vector<8x96xf32>
    %112 = arith.negf %111 : vector<8x96xf32>
    %113 = math.exp %112 : vector<8x96xf32>
    %cst_40 = arith.constant 1.000000e+00 : f32
    %114 = vector.broadcast %cst_40 : f32 to vector<8x96xf32>
    %115 = arith.addf %114, %113 : vector<8x96xf32>
    %116 = arith.divf %114, %115 : vector<8x96xf32>
    %117 = vector.extract_strided_slice %90 {offsets = [0, 96], sizes = [8, 32], strides = [1, 1]} : vector<8x128xf32> to vector<8x32xf32>
    %118 = math.tanh %117 : vector<8x32xf32>
    %119 = vector.extract_strided_slice %116 {offsets = [0, 32], sizes = [8, 32], strides = [1, 1]} : vector<8x96xf32> to vector<8x32xf32>
    %120 = arith.mulf %119, %81 : vector<8x32xf32>
    %121 = vector.extract_strided_slice %116 {offsets = [0, 0], sizes = [8, 32], strides = [1, 1]} : vector<8x96xf32> to vector<8x32xf32>
    %122 = arith.mulf %121, %118 : vector<8x32xf32>
    %123 = arith.addf %120, %122 : vector<8x32xf32>
    %124 = vector.extract_strided_slice %116 {offsets = [0, 64], sizes = [8, 32], strides = [1, 1]} : vector<8x96xf32> to vector<8x32xf32>
    %125 = math.tanh %123 : vector<8x32xf32>
    %126 = arith.mulf %124, %125 : vector<8x32xf32>
    %c8_41 = arith.constant 8 : index
    %c0_42 = arith.constant 0 : index
    %127 = vector.load %arg5[%c8_41, %c0_42] : memref<64x32xf32, #tpu.memory_space<vmem>>, vector<8x32xf32>
    tpu.vector_store %arg5[%c8_41, %c0_42], %126 {strides = array<i32>} : memref<64x32xf32, #tpu.memory_space<vmem>>, vector<8x32xf32>,
    %128 = tpu.concatenate %110, %126 in 1 : vector<8x32xf32>, vector<8x32xf32> -> vector<8x64xf32>
    %129 = arith.truncf %128 : vector<8x64xf32> to vector<8x64xbf16>
    %cst_43 = arith.constant dense<0.000000e+00> : vector<8x128xf32>
    %130 = tpu.matmul %129, %4, %cst_43 {dimension_numbers = #tpu.dot_dimension_numbers<[1], [0], [0], [1], [0, 0, 1, 1], [], []>} : vector<8x64xbf16>, vector<64x128xbf16>, vector<8x128xf32> -> vector<8x128xf32>
    %131 = vector.broadcast %14 : vector<1x128xf32> to vector<8x128xf32>
    %132 = arith.addf %130, %131 : vector<8x128xf32>
    %c24 = arith.constant 24 : index
    %c0_44 = arith.constant 0 : index
    %133 = vector.load %arg4[%c24, %c0_44] : memref<64x128xf32, #tpu.memory_space<vmem>>, vector<8x128xf32>
    %134 = arith.truncf %110 : vector<8x32xf32> to vector<8x32xbf16>
    %cst_45 = arith.constant dense<0.000000e+00> : vector<8x128xf32>
    %135 = tpu.matmul %134, %2, %cst_45 {dimension_numbers = #tpu.dot_dimension_numbers<[1], [0], [0], [1], [0, 0, 1, 1], [], []>} : vector<8x32xbf16>, vector<32x128xbf16>, vector<8x128xf32> -> vector<8x128xf32>
    %136 = arith.addf %133, %135 : vector<8x128xf32>
    %137 = vector.extract_strided_slice %136 {offsets = [0, 0], sizes = [8, 96], strides = [1, 1]} : vector<8x128xf32> to vector<8x96xf32>
    %138 = arith.negf %137 : vector<8x96xf32>
    %139 = math.exp %138 : vector<8x96xf32>
    %cst_46 = arith.constant 1.000000e+00 : f32
    %140 = vector.broadcast %cst_46 : f32 to vector<8x96xf32>
    %141 = arith.addf %140, %139 : vector<8x96xf32>
    %142 = arith.divf %140, %141 : vector<8x96xf32>
    %143 = vector.extract_strided_slice %136 {offsets = [0, 96], sizes = [8, 32], strides = [1, 1]} : vector<8x128xf32> to vector<8x32xf32>
    %144 = math.tanh %143 : vector<8x32xf32>
    %145 = vector.extract_strided_slice %142 {offsets = [0, 32], sizes = [8, 32], strides = [1, 1]} : vector<8x96xf32> to vector<8x32xf32>
    %146 = arith.mulf %145, %107 : vector<8x32xf32>
    %147 = vector.extract_strided_slice %142 {offsets = [0, 0], sizes = [8, 32], strides = [1, 1]} : vector<8x96xf32> to vector<8x32xf32>
    %148 = arith.mulf %147, %144 : vector<8x32xf32>
    %149 = arith.addf %146, %148 : vector<8x32xf32>
    %150 = vector.extract_strided_slice %142 {offsets = [0, 64], sizes = [8, 32], strides = [1, 1]} : vector<8x96xf32> to vector<8x32xf32>
    %151 = math.tanh %149 : vector<8x32xf32>
    %152 = arith.mulf %150, %151 : vector<8x32xf32>
    %153 = vector.extract_strided_slice %132 {offsets = [0, 0], sizes = [8, 96], strides = [1, 1]} : vector<8x128xf32> to vector<8x96xf32>
    %154 = arith.negf %153 : vector<8x96xf32>
    %155 = math.exp %154 : vector<8x96xf32>
    %cst_47 = arith.constant 1.000000e+00 : f32
    %156 = vector.broadcast %cst_47 : f32 to vector<8x96xf32>
    %157 = arith.addf %156, %155 : vector<8x96xf32>
    %158 = arith.divf %156, %157 : vector<8x96xf32>
    %159 = vector.extract_strided_slice %132 {offsets = [0, 96], sizes = [8, 32], strides = [1, 1]} : vector<8x128xf32> to vector<8x32xf32>
    %160 = math.tanh %159 : vector<8x32xf32>
    %161 = vector.extract_strided_slice %158 {offsets = [0, 32], sizes = [8, 32], strides = [1, 1]} : vector<8x96xf32> to vector<8x32xf32>
    %162 = arith.mulf %161, %123 : vector<8x32xf32>
    %163 = vector.extract_strided_slice %158 {offsets = [0, 0], sizes = [8, 32], strides = [1, 1]} : vector<8x96xf32> to vector<8x32xf32>
    %164 = arith.mulf %163, %160 : vector<8x32xf32>
    %165 = arith.addf %162, %164 : vector<8x32xf32>
    %166 = vector.extract_strided_slice %158 {offsets = [0, 64], sizes = [8, 32], strides = [1, 1]} : vector<8x96xf32> to vector<8x32xf32>
    %167 = math.tanh %165 : vector<8x32xf32>
    %168 = arith.mulf %166, %167 : vector<8x32xf32>
    %c16_48 = arith.constant 16 : index
    %c0_49 = arith.constant 0 : index
    %169 = vector.load %arg5[%c16_48, %c0_49] : memref<64x32xf32, #tpu.memory_space<vmem>>, vector<8x32xf32>
    tpu.vector_store %arg5[%c16_48, %c0_49], %168 {strides = array<i32>} : memref<64x32xf32, #tpu.memory_space<vmem>>, vector<8x32xf32>,
    %170 = tpu.concatenate %152, %168 in 1 : vector<8x32xf32>, vector<8x32xf32> -> vector<8x64xf32>
    %171 = arith.truncf %170 : vector<8x64xf32> to vector<8x64xbf16>
    %cst_50 = arith.constant dense<0.000000e+00> : vector<8x128xf32>
    %172 = tpu.matmul %171, %4, %cst_50 {dimension_numbers = #tpu.dot_dimension_numbers<[1], [0], [0], [1], [0, 0, 1, 1], [], []>} : vector<8x64xbf16>, vector<64x128xbf16>, vector<8x128xf32> -> vector<8x128xf32>
    %173 = vector.broadcast %14 : vector<1x128xf32> to vector<8x128xf32>
    %174 = arith.addf %172, %173 : vector<8x128xf32>
    %c32 = arith.constant 32 : index
    %c0_51 = arith.constant 0 : index
    %175 = vector.load %arg4[%c32, %c0_51] : memref<64x128xf32, #tpu.memory_space<vmem>>, vector<8x128xf32>
    %176 = arith.truncf %152 : vector<8x32xf32> to vector<8x32xbf16>
    %cst_52 = arith.constant dense<0.000000e+00> : vector<8x128xf32>
    %177 = tpu.matmul %176, %2, %cst_52 {dimension_numbers = #tpu.dot_dimension_numbers<[1], [0], [0], [1], [0, 0, 1, 1], [], []>} : vector<8x32xbf16>, vector<32x128xbf16>, vector<8x128xf32> -> vector<8x128xf32>
    %178 = arith.addf %175, %177 : vector<8x128xf32>
    %179 = vector.extract_strided_slice %178 {offsets = [0, 0], sizes = [8, 96], strides = [1, 1]} : vector<8x128xf32> to vector<8x96xf32>
    %180 = arith.negf %179 : vector<8x96xf32>
    %181 = math.exp %180 : vector<8x96xf32>
    %cst_53 = arith.constant 1.000000e+00 : f32
    %182 = vector.broadcast %cst_53 : f32 to vector<8x96xf32>
    %183 = arith.addf %182, %181 : vector<8x96xf32>
    %184 = arith.divf %182, %183 : vector<8x96xf32>
    %185 = vector.extract_strided_slice %178 {offsets = [0, 96], sizes = [8, 32], strides = [1, 1]} : vector<8x128xf32> to vector<8x32xf32>
    %186 = math.tanh %185 : vector<8x32xf32>
    %187 = vector.extract_strided_slice %184 {offsets = [0, 32], sizes = [8, 32], strides = [1, 1]} : vector<8x96xf32> to vector<8x32xf32>
    %188 = arith.mulf %187, %149 : vector<8x32xf32>
    %189 = vector.extract_strided_slice %184 {offsets = [0, 0], sizes = [8, 32], strides = [1, 1]} : vector<8x96xf32> to vector<8x32xf32>
    %190 = arith.mulf %189, %186 : vector<8x32xf32>
    %191 = arith.addf %188, %190 : vector<8x32xf32>
    %192 = vector.extract_strided_slice %184 {offsets = [0, 64], sizes = [8, 32], strides = [1, 1]} : vector<8x96xf32> to vector<8x32xf32>
    %193 = math.tanh %191 : vector<8x32xf32>
    %194 = arith.mulf %192, %193 : vector<8x32xf32>
    %195 = vector.extract_strided_slice %174 {offsets = [0, 0], sizes = [8, 96], strides = [1, 1]} : vector<8x128xf32> to vector<8x96xf32>
    %196 = arith.negf %195 : vector<8x96xf32>
    %197 = math.exp %196 : vector<8x96xf32>
    %cst_54 = arith.constant 1.000000e+00 : f32
    %198 = vector.broadcast %cst_54 : f32 to vector<8x96xf32>
    %199 = arith.addf %198, %197 : vector<8x96xf32>
    %200 = arith.divf %198, %199 : vector<8x96xf32>
    %201 = vector.extract_strided_slice %174 {offsets = [0, 96], sizes = [8, 32], strides = [1, 1]} : vector<8x128xf32> to vector<8x32xf32>
    %202 = math.tanh %201 : vector<8x32xf32>
    %203 = vector.extract_strided_slice %200 {offsets = [0, 32], sizes = [8, 32], strides = [1, 1]} : vector<8x96xf32> to vector<8x32xf32>
    %204 = arith.mulf %203, %165 : vector<8x32xf32>
    %205 = vector.extract_strided_slice %200 {offsets = [0, 0], sizes = [8, 32], strides = [1, 1]} : vector<8x96xf32> to vector<8x32xf32>
    %206 = arith.mulf %205, %202 : vector<8x32xf32>
    %207 = arith.addf %204, %206 : vector<8x32xf32>
    %208 = vector.extract_strided_slice %200 {offsets = [0, 64], sizes = [8, 32], strides = [1, 1]} : vector<8x96xf32> to vector<8x32xf32>
    %209 = math.tanh %207 : vector<8x32xf32>
    %210 = arith.mulf %208, %209 : vector<8x32xf32>
    %c24_55 = arith.constant 24 : index
    %c0_56 = arith.constant 0 : index
    %211 = vector.load %arg5[%c24_55, %c0_56] : memref<64x32xf32, #tpu.memory_space<vmem>>, vector<8x32xf32>
    tpu.vector_store %arg5[%c24_55, %c0_56], %210 {strides = array<i32>} : memref<64x32xf32, #tpu.memory_space<vmem>>, vector<8x32xf32>,
    %212 = tpu.concatenate %194, %210 in 1 : vector<8x32xf32>, vector<8x32xf32> -> vector<8x64xf32>
    %213 = arith.truncf %212 : vector<8x64xf32> to vector<8x64xbf16>
    %cst_57 = arith.constant dense<0.000000e+00> : vector<8x128xf32>
    %214 = tpu.matmul %213, %4, %cst_57 {dimension_numbers = #tpu.dot_dimension_numbers<[1], [0], [0], [1], [0, 0, 1, 1], [], []>} : vector<8x64xbf16>, vector<64x128xbf16>, vector<8x128xf32> -> vector<8x128xf32>
    %215 = vector.broadcast %14 : vector<1x128xf32> to vector<8x128xf32>
    %216 = arith.addf %214, %215 : vector<8x128xf32>
    %c40 = arith.constant 40 : index
    %c0_58 = arith.constant 0 : index
    %217 = vector.load %arg4[%c40, %c0_58] : memref<64x128xf32, #tpu.memory_space<vmem>>, vector<8x128xf32>
    %218 = arith.truncf %194 : vector<8x32xf32> to vector<8x32xbf16>
    %cst_59 = arith.constant dense<0.000000e+00> : vector<8x128xf32>
    %219 = tpu.matmul %218, %2, %cst_59 {dimension_numbers = #tpu.dot_dimension_numbers<[1], [0], [0], [1], [0, 0, 1, 1], [], []>} : vector<8x32xbf16>, vector<32x128xbf16>, vector<8x128xf32> -> vector<8x128xf32>
    %220 = arith.addf %217, %219 : vector<8x128xf32>
    %221 = vector.extract_strided_slice %220 {offsets = [0, 0], sizes = [8, 96], strides = [1, 1]} : vector<8x128xf32> to vector<8x96xf32>
    %222 = arith.negf %221 : vector<8x96xf32>
    %223 = math.exp %222 : vector<8x96xf32>
    %cst_60 = arith.constant 1.000000e+00 : f32
    %224 = vector.broadcast %cst_60 : f32 to vector<8x96xf32>
    %225 = arith.addf %224, %223 : vector<8x96xf32>
    %226 = arith.divf %224, %225 : vector<8x96xf32>
    %227 = vector.extract_strided_slice %220 {offsets = [0, 96], sizes = [8, 32], strides = [1, 1]} : vector<8x128xf32> to vector<8x32xf32>
    %228 = math.tanh %227 : vector<8x32xf32>
    %229 = vector.extract_strided_slice %226 {offsets = [0, 32], sizes = [8, 32], strides = [1, 1]} : vector<8x96xf32> to vector<8x32xf32>
    %230 = arith.mulf %229, %191 : vector<8x32xf32>
    %231 = vector.extract_strided_slice %226 {offsets = [0, 0], sizes = [8, 32], strides = [1, 1]} : vector<8x96xf32> to vector<8x32xf32>
    %232 = arith.mulf %231, %228 : vector<8x32xf32>
    %233 = arith.addf %230, %232 : vector<8x32xf32>
    %234 = vector.extract_strided_slice %226 {offsets = [0, 64], sizes = [8, 32], strides = [1, 1]} : vector<8x96xf32> to vector<8x32xf32>
    %235 = math.tanh %233 : vector<8x32xf32>
    %236 = arith.mulf %234, %235 : vector<8x32xf32>
    %237 = vector.extract_strided_slice %216 {offsets = [0, 0], sizes = [8, 96], strides = [1, 1]} : vector<8x128xf32> to vector<8x96xf32>
    %238 = arith.negf %237 : vector<8x96xf32>
    %239 = math.exp %238 : vector<8x96xf32>
    %cst_61 = arith.constant 1.000000e+00 : f32
    %240 = vector.broadcast %cst_61 : f32 to vector<8x96xf32>
    %241 = arith.addf %240, %239 : vector<8x96xf32>
    %242 = arith.divf %240, %241 : vector<8x96xf32>
    %243 = vector.extract_strided_slice %216 {offsets = [0, 96], sizes = [8, 32], strides = [1, 1]} : vector<8x128xf32> to vector<8x32xf32>
    %244 = math.tanh %243 : vector<8x32xf32>
    %245 = vector.extract_strided_slice %242 {offsets = [0, 32], sizes = [8, 32], strides = [1, 1]} : vector<8x96xf32> to vector<8x32xf32>
    %246 = arith.mulf %245, %207 : vector<8x32xf32>
    %247 = vector.extract_strided_slice %242 {offsets = [0, 0], sizes = [8, 32], strides = [1, 1]} : vector<8x96xf32> to vector<8x32xf32>
    %248 = arith.mulf %247, %244 : vector<8x32xf32>
    %249 = arith.addf %246, %248 : vector<8x32xf32>
    %250 = vector.extract_strided_slice %242 {offsets = [0, 64], sizes = [8, 32], strides = [1, 1]} : vector<8x96xf32> to vector<8x32xf32>
    %251 = math.tanh %249 : vector<8x32xf32>
    %252 = arith.mulf %250, %251 : vector<8x32xf32>
    %c32_62 = arith.constant 32 : index
    %c0_63 = arith.constant 0 : index
    %253 = vector.load %arg5[%c32_62, %c0_63] : memref<64x32xf32, #tpu.memory_space<vmem>>, vector<8x32xf32>
    tpu.vector_store %arg5[%c32_62, %c0_63], %252 {strides = array<i32>} : memref<64x32xf32, #tpu.memory_space<vmem>>, vector<8x32xf32>,
    %254 = tpu.concatenate %236, %252 in 1 : vector<8x32xf32>, vector<8x32xf32> -> vector<8x64xf32>
    %255 = arith.truncf %254 : vector<8x64xf32> to vector<8x64xbf16>
    %cst_64 = arith.constant dense<0.000000e+00> : vector<8x128xf32>
    %256 = tpu.matmul %255, %4, %cst_64 {dimension_numbers = #tpu.dot_dimension_numbers<[1], [0], [0], [1], [0, 0, 1, 1], [], []>} : vector<8x64xbf16>, vector<64x128xbf16>, vector<8x128xf32> -> vector<8x128xf32>
    %257 = vector.broadcast %14 : vector<1x128xf32> to vector<8x128xf32>
    %258 = arith.addf %256, %257 : vector<8x128xf32>
    %c48_65 = arith.constant 48 : index
    %c0_66 = arith.constant 0 : index
    %259 = vector.load %arg4[%c48_65, %c0_66] : memref<64x128xf32, #tpu.memory_space<vmem>>, vector<8x128xf32>
    %260 = arith.truncf %236 : vector<8x32xf32> to vector<8x32xbf16>
    %cst_67 = arith.constant dense<0.000000e+00> : vector<8x128xf32>
    %261 = tpu.matmul %260, %2, %cst_67 {dimension_numbers = #tpu.dot_dimension_numbers<[1], [0], [0], [1], [0, 0, 1, 1], [], []>} : vector<8x32xbf16>, vector<32x128xbf16>, vector<8x128xf32> -> vector<8x128xf32>
    %262 = arith.addf %259, %261 : vector<8x128xf32>
    %263 = vector.extract_strided_slice %262 {offsets = [0, 0], sizes = [8, 96], strides = [1, 1]} : vector<8x128xf32> to vector<8x96xf32>
    %264 = arith.negf %263 : vector<8x96xf32>
    %265 = math.exp %264 : vector<8x96xf32>
    %cst_68 = arith.constant 1.000000e+00 : f32
    %266 = vector.broadcast %cst_68 : f32 to vector<8x96xf32>
    %267 = arith.addf %266, %265 : vector<8x96xf32>
    %268 = arith.divf %266, %267 : vector<8x96xf32>
    %269 = vector.extract_strided_slice %262 {offsets = [0, 96], sizes = [8, 32], strides = [1, 1]} : vector<8x128xf32> to vector<8x32xf32>
    %270 = math.tanh %269 : vector<8x32xf32>
    %271 = vector.extract_strided_slice %268 {offsets = [0, 32], sizes = [8, 32], strides = [1, 1]} : vector<8x96xf32> to vector<8x32xf32>
    %272 = arith.mulf %271, %233 : vector<8x32xf32>
    %273 = vector.extract_strided_slice %268 {offsets = [0, 0], sizes = [8, 32], strides = [1, 1]} : vector<8x96xf32> to vector<8x32xf32>
    %274 = arith.mulf %273, %270 : vector<8x32xf32>
    %275 = arith.addf %272, %274 : vector<8x32xf32>
    %276 = vector.extract_strided_slice %268 {offsets = [0, 64], sizes = [8, 32], strides = [1, 1]} : vector<8x96xf32> to vector<8x32xf32>
    %277 = math.tanh %275 : vector<8x32xf32>
    %278 = arith.mulf %276, %277 : vector<8x32xf32>
    %279 = vector.extract_strided_slice %258 {offsets = [0, 0], sizes = [8, 96], strides = [1, 1]} : vector<8x128xf32> to vector<8x96xf32>
    %280 = arith.negf %279 : vector<8x96xf32>
    %281 = math.exp %280 : vector<8x96xf32>
    %cst_69 = arith.constant 1.000000e+00 : f32
    %282 = vector.broadcast %cst_69 : f32 to vector<8x96xf32>
    %283 = arith.addf %282, %281 : vector<8x96xf32>
    %284 = arith.divf %282, %283 : vector<8x96xf32>
    %285 = vector.extract_strided_slice %258 {offsets = [0, 96], sizes = [8, 32], strides = [1, 1]} : vector<8x128xf32> to vector<8x32xf32>
    %286 = math.tanh %285 : vector<8x32xf32>
    %287 = vector.extract_strided_slice %284 {offsets = [0, 32], sizes = [8, 32], strides = [1, 1]} : vector<8x96xf32> to vector<8x32xf32>
    %288 = arith.mulf %287, %249 : vector<8x32xf32>
    %289 = vector.extract_strided_slice %284 {offsets = [0, 0], sizes = [8, 32], strides = [1, 1]} : vector<8x96xf32> to vector<8x32xf32>
    %290 = arith.mulf %289, %286 : vector<8x32xf32>
    %291 = arith.addf %288, %290 : vector<8x32xf32>
    %292 = vector.extract_strided_slice %284 {offsets = [0, 64], sizes = [8, 32], strides = [1, 1]} : vector<8x96xf32> to vector<8x32xf32>
    %293 = math.tanh %291 : vector<8x32xf32>
    %294 = arith.mulf %292, %293 : vector<8x32xf32>
    %c40_70 = arith.constant 40 : index
    %c0_71 = arith.constant 0 : index
    %295 = vector.load %arg5[%c40_70, %c0_71] : memref<64x32xf32, #tpu.memory_space<vmem>>, vector<8x32xf32>
    tpu.vector_store %arg5[%c40_70, %c0_71], %294 {strides = array<i32>} : memref<64x32xf32, #tpu.memory_space<vmem>>, vector<8x32xf32>,
    %296 = tpu.concatenate %278, %294 in 1 : vector<8x32xf32>, vector<8x32xf32> -> vector<8x64xf32>
    %297 = arith.truncf %296 : vector<8x64xf32> to vector<8x64xbf16>
    %cst_72 = arith.constant dense<0.000000e+00> : vector<8x128xf32>
    %298 = tpu.matmul %297, %4, %cst_72 {dimension_numbers = #tpu.dot_dimension_numbers<[1], [0], [0], [1], [0, 0, 1, 1], [], []>} : vector<8x64xbf16>, vector<64x128xbf16>, vector<8x128xf32> -> vector<8x128xf32>
    %299 = vector.broadcast %14 : vector<1x128xf32> to vector<8x128xf32>
    %300 = arith.addf %298, %299 : vector<8x128xf32>
    %c56 = arith.constant 56 : index
    %c0_73 = arith.constant 0 : index
    %301 = vector.load %arg4[%c56, %c0_73] : memref<64x128xf32, #tpu.memory_space<vmem>>, vector<8x128xf32>
    %302 = arith.truncf %278 : vector<8x32xf32> to vector<8x32xbf16>
    %cst_74 = arith.constant dense<0.000000e+00> : vector<8x128xf32>
    %303 = tpu.matmul %302, %2, %cst_74 {dimension_numbers = #tpu.dot_dimension_numbers<[1], [0], [0], [1], [0, 0, 1, 1], [], []>} : vector<8x32xbf16>, vector<32x128xbf16>, vector<8x128xf32> -> vector<8x128xf32>
    %304 = arith.addf %301, %303 : vector<8x128xf32>
    %305 = vector.extract_strided_slice %304 {offsets = [0, 0], sizes = [8, 96], strides = [1, 1]} : vector<8x128xf32> to vector<8x96xf32>
    %306 = arith.negf %305 : vector<8x96xf32>
    %307 = math.exp %306 : vector<8x96xf32>
    %cst_75 = arith.constant 1.000000e+00 : f32
    %308 = vector.broadcast %cst_75 : f32 to vector<8x96xf32>
    %309 = arith.addf %308, %307 : vector<8x96xf32>
    %310 = arith.divf %308, %309 : vector<8x96xf32>
    %311 = vector.extract_strided_slice %304 {offsets = [0, 96], sizes = [8, 32], strides = [1, 1]} : vector<8x128xf32> to vector<8x32xf32>
    %312 = math.tanh %311 : vector<8x32xf32>
    %313 = vector.extract_strided_slice %310 {offsets = [0, 32], sizes = [8, 32], strides = [1, 1]} : vector<8x96xf32> to vector<8x32xf32>
    %314 = arith.mulf %313, %275 : vector<8x32xf32>
    %315 = vector.extract_strided_slice %310 {offsets = [0, 0], sizes = [8, 32], strides = [1, 1]} : vector<8x96xf32> to vector<8x32xf32>
    %316 = arith.mulf %315, %312 : vector<8x32xf32>
    %317 = arith.addf %314, %316 : vector<8x32xf32>
    %318 = vector.extract_strided_slice %310 {offsets = [0, 64], sizes = [8, 32], strides = [1, 1]} : vector<8x96xf32> to vector<8x32xf32>
    %319 = math.tanh %317 : vector<8x32xf32>
    %320 = arith.mulf %318, %319 : vector<8x32xf32>
    %321 = vector.extract_strided_slice %300 {offsets = [0, 0], sizes = [8, 96], strides = [1, 1]} : vector<8x128xf32> to vector<8x96xf32>
    %322 = arith.negf %321 : vector<8x96xf32>
    %323 = math.exp %322 : vector<8x96xf32>
    %cst_76 = arith.constant 1.000000e+00 : f32
    %324 = vector.broadcast %cst_76 : f32 to vector<8x96xf32>
    %325 = arith.addf %324, %323 : vector<8x96xf32>
    %326 = arith.divf %324, %325 : vector<8x96xf32>
    %327 = vector.extract_strided_slice %300 {offsets = [0, 96], sizes = [8, 32], strides = [1, 1]} : vector<8x128xf32> to vector<8x32xf32>
    %328 = math.tanh %327 : vector<8x32xf32>
    %329 = vector.extract_strided_slice %326 {offsets = [0, 32], sizes = [8, 32], strides = [1, 1]} : vector<8x96xf32> to vector<8x32xf32>
    %330 = arith.mulf %329, %291 : vector<8x32xf32>
    %331 = vector.extract_strided_slice %326 {offsets = [0, 0], sizes = [8, 32], strides = [1, 1]} : vector<8x96xf32> to vector<8x32xf32>
    %332 = arith.mulf %331, %328 : vector<8x32xf32>
    %333 = arith.addf %330, %332 : vector<8x32xf32>
    %334 = vector.extract_strided_slice %326 {offsets = [0, 64], sizes = [8, 32], strides = [1, 1]} : vector<8x96xf32> to vector<8x32xf32>
    %335 = math.tanh %333 : vector<8x32xf32>
    %336 = arith.mulf %334, %335 : vector<8x32xf32>
    %c48_77 = arith.constant 48 : index
    %c0_78 = arith.constant 0 : index
    %337 = vector.load %arg5[%c48_77, %c0_78] : memref<64x32xf32, #tpu.memory_space<vmem>>, vector<8x32xf32>
    tpu.vector_store %arg5[%c48_77, %c0_78], %336 {strides = array<i32>} : memref<64x32xf32, #tpu.memory_space<vmem>>, vector<8x32xf32>,
    %338 = tpu.concatenate %320, %336 in 1 : vector<8x32xf32>, vector<8x32xf32> -> vector<8x64xf32>
    %339 = arith.truncf %338 : vector<8x64xf32> to vector<8x64xbf16>
    %cst_79 = arith.constant dense<0.000000e+00> : vector<8x128xf32>
    %340 = tpu.matmul %339, %4, %cst_79 {dimension_numbers = #tpu.dot_dimension_numbers<[1], [0], [0], [1], [0, 0, 1, 1], [], []>} : vector<8x64xbf16>, vector<64x128xbf16>, vector<8x128xf32> -> vector<8x128xf32>
    %341 = vector.broadcast %14 : vector<1x128xf32> to vector<8x128xf32>
    %342 = arith.addf %340, %341 : vector<8x128xf32>
    %343 = vector.extract_strided_slice %342 {offsets = [0, 0], sizes = [8, 96], strides = [1, 1]} : vector<8x128xf32> to vector<8x96xf32>
    %344 = arith.negf %343 : vector<8x96xf32>
    %345 = math.exp %344 : vector<8x96xf32>
    %cst_80 = arith.constant 1.000000e+00 : f32
    %346 = vector.broadcast %cst_80 : f32 to vector<8x96xf32>
    %347 = arith.addf %346, %345 : vector<8x96xf32>
    %348 = arith.divf %346, %347 : vector<8x96xf32>
    %349 = vector.extract_strided_slice %342 {offsets = [0, 96], sizes = [8, 32], strides = [1, 1]} : vector<8x128xf32> to vector<8x32xf32>
    %350 = math.tanh %349 : vector<8x32xf32>
    %351 = vector.extract_strided_slice %348 {offsets = [0, 32], sizes = [8, 32], strides = [1, 1]} : vector<8x96xf32> to vector<8x32xf32>
    %352 = arith.mulf %351, %333 : vector<8x32xf32>
    %353 = vector.extract_strided_slice %348 {offsets = [0, 0], sizes = [8, 32], strides = [1, 1]} : vector<8x96xf32> to vector<8x32xf32>
    %354 = arith.mulf %353, %350 : vector<8x32xf32>
    %355 = arith.addf %352, %354 : vector<8x32xf32>
    %356 = vector.extract_strided_slice %348 {offsets = [0, 64], sizes = [8, 32], strides = [1, 1]} : vector<8x96xf32> to vector<8x32xf32>
    %357 = math.tanh %355 : vector<8x32xf32>
    %358 = arith.mulf %356, %357 : vector<8x32xf32>
    %c56_81 = arith.constant 56 : index
    %c0_82 = arith.constant 0 : index
    %359 = vector.load %arg5[%c56_81, %c0_82] : memref<64x32xf32, #tpu.memory_space<vmem>>, vector<8x32xf32>
    tpu.vector_store %arg5[%c56_81, %c0_82], %358 {strides = array<i32>} : memref<64x32xf32, #tpu.memory_space<vmem>>, vector<8x32xf32>,
    %c0_83 = arith.constant 0 : index
    %c0_84 = arith.constant 0 : index
    %360 = vector.load %arg5[%c0_83, %c0_84] : memref<64x32xf32, #tpu.memory_space<vmem>>, vector<64x32xf32>
    %cst_85 = arith.constant dense<0.000000e+00> : vector<8x32xf32>
    %361 = tpu.matmul %358, %5, %cst_85 {dimension_numbers = #tpu.dot_dimension_numbers<[1], [0], [0], [1], [0, 0, 1, 1], [], []>} : vector<8x32xf32>, vector<32x32xf32>, vector<8x32xf32> -> vector<8x32xf32>
    %362 = vector.broadcast %15 : vector<1x32xf32> to vector<8x32xf32>
    %363 = arith.addf %361, %362 : vector<8x32xf32>
    %cst_86 = arith.constant dense<0.000000e+00> : vector<64x32xf32>
    %364 = tpu.matmul %360, %6, %cst_86 {dimension_numbers = #tpu.dot_dimension_numbers<[1], [0], [0], [1], [0, 0, 1, 1], [], []>} : vector<64x32xf32>, vector<32x32xf32>, vector<64x32xf32> -> vector<64x32xf32>
    %365 = vector.broadcast %16 : vector<1x32xf32> to vector<64x32xf32>
    %366 = arith.addf %364, %365 : vector<64x32xf32>
    %cst_87 = arith.constant dense<0.000000e+00> : vector<64x32xf32>
    %367 = tpu.matmul %360, %7, %cst_87 {dimension_numbers = #tpu.dot_dimension_numbers<[1], [0], [0], [1], [0, 0, 1, 1], [], []>} : vector<64x32xf32>, vector<32x32xf32>, vector<64x32xf32> -> vector<64x32xf32>
    %368 = vector.broadcast %17 : vector<1x32xf32> to vector<64x32xf32>
    %369 = arith.addf %367, %368 : vector<64x32xf32>
    %370 = tpu.concatenate %363, %363, %363, %363, %363, %363, %363, %363 in 0 : vector<8x32xf32>, vector<8x32xf32>, vector<8x32xf32>, vector<8x32xf32>, vector<8x32xf32>, vector<8x32xf32>, vector<8x32xf32>, vector<8x32xf32> -> vector<64x32xf32>
    %371 = arith.mulf %370, %366 : vector<64x32xf32>
    %cst_88 = arith.constant dense<0.000000e+00> : vector<64x8xf32>
    %372 = tpu.matmul %371, %9, %cst_88 {dimension_numbers = #tpu.dot_dimension_numbers<[1], [0], [0], [1], [0, 0, 1, 1], [], []>} : vector<64x32xf32>, vector<32x8xf32>, vector<64x8xf32> -> vector<64x8xf32>
    %373 = vector.shape_cast %372 : vector<64x8xf32> to vector<8x8x8xf32>
    %cst_89 = arith.constant dense<0xFF800000> : vector<8x8xf32>
    %374 = vector.multi_reduction <maximumf>, %373, %cst_89 [0] : vector<8x8x8xf32> to vector<8x8xf32>
    %375 = vector.shape_cast %374 : vector<8x8xf32> to vector<1x8x8xf32>
    %376 = vector.broadcast %375 : vector<1x8x8xf32> to vector<8x8x8xf32>
    %377 = arith.subf %373, %376 : vector<8x8x8xf32>
    %378 = math.exp %377 : vector<8x8x8xf32>
    %cst_90 = arith.constant dense<0.000000e+00> : vector<8x8xf32>
    %379 = vector.multi_reduction <add>, %378, %cst_90 [0] : vector<8x8x8xf32> to vector<8x8xf32>
    %380 = vector.shape_cast %379 : vector<8x8xf32> to vector<1x8x8xf32>
    %381 = vector.broadcast %380 : vector<1x8x8xf32> to vector<8x8x8xf32>
    %382 = arith.divf %378, %381 : vector<8x8x8xf32>
    %383 = vector.shape_cast %382 : vector<8x8x8xf32> to vector<64x8xf32>
    %cst_91 = arith.constant dense<0.000000e+00> : vector<64x32xf32>
    %384 = tpu.matmul %383, %10, %cst_91 {dimension_numbers = #tpu.dot_dimension_numbers<[1], [0], [0], [1], [0, 0, 1, 1], [], []>} : vector<64x8xf32>, vector<8x32xf32>, vector<64x32xf32> -> vector<64x32xf32>
    %385 = arith.mulf %384, %369 : vector<64x32xf32>
    %386 = vector.shape_cast %385 : vector<64x32xf32> to vector<8x8x32xf32>
    %cst_92 = arith.constant dense<0.000000e+00> : vector<8x32xf32>
    %387 = vector.multi_reduction <add>, %386, %cst_92 [0] : vector<8x8x32xf32> to vector<8x32xf32>
    %cst_93 = arith.constant dense<0.000000e+00> : vector<8x32xf32>
    %388 = tpu.matmul %387, %8, %cst_93 {dimension_numbers = #tpu.dot_dimension_numbers<[1], [0], [0], [1], [0, 0, 1, 1], [], []>} : vector<8x32xf32>, vector<32x32xf32>, vector<8x32xf32> -> vector<8x32xf32>
    %389 = vector.broadcast %18 : vector<1x32xf32> to vector<8x32xf32>
    %390 = arith.addf %388, %389 : vector<8x32xf32>
    %cst_94 = arith.constant dense<0.000000e+00> : vector<8x16xf32>
    %391 = tpu.matmul %390, %11, %cst_94 {dimension_numbers = #tpu.dot_dimension_numbers<[1], [0], [0], [1], [0, 0, 1, 1], [], []>} : vector<8x32xf32>, vector<32x16xf32>, vector<8x16xf32> -> vector<8x16xf32>
    %392 = vector.broadcast %19 : vector<1x16xf32> to vector<8x16xf32>
    %393 = arith.addf %391, %392 : vector<8x16xf32>
    %cst_95 = arith.constant 0.000000e+00 : f32
    %394 = vector.broadcast %cst_95 : f32 to vector<8x16xf32>
    %395 = arith.maximumf %393, %394 : vector<8x16xf32>
    %cst_96 = arith.constant dense<0.000000e+00> : vector<8x128xf32>
    %396 = tpu.matmul %395, %12, %cst_96 {dimension_numbers = #tpu.dot_dimension_numbers<[1], [0], [0], [1], [0, 0, 1, 1], [], []>} : vector<8x16xf32>, vector<16x128xf32>, vector<8x128xf32> -> vector<8x128xf32>
    %397 = vector.broadcast %20 : vector<1x128xf32> to vector<8x128xf32>
    %398 = arith.addf %396, %397 : vector<8x128xf32>
    %c0_97 = arith.constant 0 : index
    %c0_98 = arith.constant 0 : index
    %399 = vector.load %arg3[%c0_97, %c0_98] : memref<8x128xf32, #tpu.memory_space<vmem>>, vector<8x128xf32>
    tpu.vector_store %arg3[%c0_97, %c0_98], %398 {strides = array<i32>} : memref<8x128xf32, #tpu.memory_space<vmem>>, vector<8x128xf32>,
    %c0_99 = arith.constant 0 : index
    %c0_100 = arith.constant 0 : index
    %400 = vector.load %arg3[%c0_99, %c0_100] : memref<8x128xf32, #tpu.memory_space<vmem>>, vector<8x32xf32>
    tpu.vector_store %arg3[%c0_99, %c0_100], %390 {strides = array<i32>} : memref<8x128xf32, #tpu.memory_space<vmem>>, vector<8x32xf32>,
    return
  }
}

</mosaic_0001>

<bundles_post_ra>
// kernel: lstm_price_predictor_forward.1
= control target key start
LH: loop header
LB: loop body
LE: loop exit
PB: predicated region body
PF: predicated region fallthrough
CT: control target
= control target key end

     0   :  { %8 = vsyncpa [#allocation5], 0  ;;  %s3001_s12 = smov [#allocation4]   ;;  %s3536_s0 = inlined_call_operand.vmem [shape: f32[64,16], index: 0, kind: input, shape index: {}]   ;;  %s3537_s1 = inlined_call_operand.hbm [shape: f32[328,128], index: 1, kind: input, shape index: {}]   ;;  %s3538_s2 = inlined_call_operand.vmem [shape: f32[8,128], index: 2, kind: input, shape index: {}]   ;;  %s3539_s3 = inlined_call_operand.vmem [shape: f32[8,128], index: 3, kind: output, shape index: {}]  }
   0x1   :  { %s16_s13 = sshll.u32 %s3001_s12, 4  ;;  %s17_s13 = int_to_ptr.vmem [resolvable:$true] %s16_s13 }
   0x2   :  { %s2987_s14 = scalar_lea.vmem %s17_s13, 5248  ;;  %p2992_p1 = scmp.lt.s32.totalorder %s17_s13, %s17_s13 }
   0x3   :  { %p2988_p0 = scmp.ne.s32.totalorder %s17_s13, %s2987_s14  ;;  %p2993_p2 = scmp.lt.s32.totalorder %s2987_s14, %s2987_s14 }
   0x5   :  { %p2994_p3 = por %p2993_p2, %p2992_p1 }
   0x7   :  { %p2995_p4 = pnand %p2994_p3, %p2988_p0 }
   0x9   :  { %2998 = shalt.err (!%p2995_p4)
}
   0xa   :  { %s3002_s15 = smov 128   ;;  %s3003_s16 = smov 8  }
   0xb   :  { %22 = dma.hbm_to_vmem [thread:$0]  %s3537_s1, 5248, %s17_s13, [#allocation5], %s3002_s15, %s3002_s15, %s3003_s16  }
   0xc   :  { %2999 = dma.done.wait [#allocation5], 5248  }
   0xd   :  { %3000 = vsyncadd [#allocation5], 4294962048  ;;  %vm96_vm0 = vcmask 130048   ;;  %v30_v0 = vld [vmem:[#allocation4 + $0x8] sm:$0xff]  ;;  %v29_v1 = vld [vmem:[#allocation4] sm:$0xff]  ;;  %s3004_s24 = smov 32  }
   0xe   :  { %v84_v2 = vld [vmem:[%s3536_s0] sm:$0xff]  ;;  %2545 = vmatprep.subr.mxu0 %v30_v0  ;;  %v85_v3 = vld [vmem:[%s3536_s0 + $0x8] sm:$0xff]  ;;  %v37_v20 = vld [vmem:[#allocation4 + $0x30] sm:$0xff]  ;;  %v3005_v21 = vmov 0.0   ;;  %vm3006_vm1 = vmmov 0   ;;  %s3007_s25 = smov 64  }
   0xf   :  { %2549 = vmatprep.mubr.msk.f32.mxu0 %vm96_vm0, %v84_v2  ;;  %2546 = vmatpush3.msra.mxu0 %v30_v0  ;;  %v3045_v5 = vld [vmem:[%s3538_s2] ss:$0 sm:$0xff]  ;;  %v40_v19 = vld [vmem:[#allocation4 + $0x48] sm:$0xff]  ;;  %v38_v23 = vld [vmem:[#allocation4 + $0x38] sm:$0xff]  ;;  %vm267_vm2 = vcmask 261120   ;;  %s3008_s13 = smov 96  }
  0x10   :  { %2547 = vmatprep.subr.mxu0 %v29_v1  ;;  %v39_v18 = vld [vmem:[#allocation4 + $0x40] sm:$0xff]  ;;  %2561 = vmatprep.subr.bf16.mxu1 %v3005_v21  ;;  %v3060_v24 = vpack.c.bf16 %v38_v23, %v37_v20  ;;  %v34_v30 = vld [vmem:[#allocation4 + $0x28] sm:$0xff]  ;;  %v31_v32 = vld [vmem:[#allocation4 + $0x10] sm:$0xff]  ;;  %vm415_vm3 = vcmask 523264   ;;  %vm1875_vm4 = vcmask 64512  }
  0x11   :  { %2548 = vmatpush3.msra.mxu0 %v29_v1  ;;  %v3054_v22 = vpack.c.bf16 %v40_v19, %v39_v18  ;;  %2565 = vmatprep.mubr.msk.bf16.mxu1 %vm3006_vm1, %v3005_v21  ;;  %v33_v29 = vld [vmem:[#allocation4 + $0x20] sm:$0xff]  ;;  %v32_v33 = vld [vmem:[#allocation4 + $0x18] sm:$0xff] }
  0x12   :  { %2550 = vmatmul.mubr.msk.f32.vlgmr.msra.gmra.mxu0 %vm96_vm0, %v85_v3  ;;  %2577 = vmatprep.subr.bf16.mxu0 %v3005_v21  ;;  %v3067_v31 = vpack.c.bf16 %v34_v30, %v33_v29  ;;  %v3071_v35 = vpack.c.bf16 %v32_v33, %v31_v32  ;;  %v3088_v36 = vld [vmem:[%s3538_s2 + $0x1] ss:$0 sm:$0xff]  ;;  %v91_v18 = vld [vmem:[%s3536_s0 + $0x38] sm:$0xff] }
  0x13   :  { %2562 = vmatpush3.bf16.msra.mxu1 %v3054_v22 }
  0x14   :  { %2563 = vmatprep.subr.bf16.mxu1 %v3005_v21 }
  0x17   :  { %2564 = vmatpush3.bf16.msra.mxu1 %v3060_v24 }
  0x18   :  { %2569 = vmatprep.subr.bf16.mxu1 %v3005_v21 }
  0xd2   :  { %v3040_v4 = vpop.f32.mrf.mxu0 }
  0xd3   :  { %v193_v42 = vadd.f32 %v3040_v4, %v3045_v5 }
  0xd4   :  { %v187_v6 = vpop.f32.mrf.mxu0 }
  0xd5   :  { %v188_v7 = vadd.f32 %v3045_v5, %v187_v6  ;;  %v43_v6 = vld [vmem:[#allocation4 + $0x60] sm:$0xff] }
  0xd7   :  { %2831 = vtanh.f32 %v188_v7  ;;  %v2339_v9 = vmul.f32 -1.442695, %v188_v7  ;;  %v44_v7 = vld [vmem:[#allocation4 + $0x68] sm:$0xff] }
  0xd9   :  { %2833 = vpow2.f32 %v2339_v9  ;;  %v3108_v9 = vpack.c.bf16 %v44_v7, %v43_v6 }
  0xdb   :  { %2578 = vmatpush3.bf16.msra.mxu0 %v3108_v9 }
  0xdc   :  { %2579 = vmatprep.subr.bf16.mxu0 %v3005_v21 }
  0xe4   :  { %v2832_v8 = vpop.eup %2831 }
  0xe5   :  { %244 = vrot.lane.b32.xlu0 %v2832_v8, %s3004_s24  ;;  %v86_v8 = vld [vmem:[%s3536_s0 + $0x10] sm:$0xff] }
  0xe6   :  { %v2834_v10 = vpop.eup %2833  ;;  %2552 = vmatprep.mubr.msk.f32.mxu0 %vm96_vm0, %v86_v8 }
  0xe7   :  { %v238_v11 = vadd.f32 1.0, %v2834_v10  ;;  %v87_v10 = vld [vmem:[%s3536_s0 + $0x18] sm:$0xff] }
  0xe8   :  { %2553 = vmatmul.mubr.msk.f32.gmra.mxu0 %vm96_vm0, %v87_v10 }
  0xe9   :  { %2835 = vrcp.f32 %v238_v11 }
  0xf6   :  { %v2836_v12 = vpop.eup %2835 }
  0xf7   :  { %v242_v15 = vmul.f32 0.0, %v2836_v12 }
 0x157   :  { %v245_v13 = vpop.permute.xlu0 %244 }
 0x158   :  { %v247_v14 = vmul.f32 %v2836_v12, %v245_v13  ;;  %v42_v13 = vld [vmem:[#allocation4 + $0x58] sm:$0xff] }
 0x15a   :  { %249 = vrot.lane.b32.xlu0 %v247_v14, %s3004_s24 }
 0x1a8   :  { %v3169_v33 = vpop.f32.mrf.mxu0 }
 0x1cc   :  { %v250_v16 = vpop.permute.xlu0 %249 }
 0x1cd   :  { %v3050_v17 = vadd.f32 %v250_v16, %v242_v15  ;;  %v88_v15 = vld [vmem:[%s3536_s0 + $0x20] sm:$0xff]  ;;  %v89_v16 = vld [vmem:[%s3536_s0 + $0x28] sm:$0xff] }
 0x1ce   :  { %2555 = vmatprep.mubr.msk.f32.mxu0 %vm96_vm0, %v88_v15 }
 0x1cf   :  { %2837 = vtanh.f32 %v3050_v17  ;;  %2556 = vmatmul.mubr.msk.f32.gmra.mxu0 %vm96_vm0, %v89_v16 }
 0x1dc   :  { %v2838_v25 = vpop.eup %2837 }
 0x1dd   :  { %255 = vrot.lane.b32.xlu1 %v2838_v25, %s3004_s24 }
 0x24f   :  { %v256_v26 = vpop.permute.xlu1 %255 }
 0x250   :  { %v258_v27 = vmul.f32 %v2836_v12, %v256_v26  ;;  %v41_v12 = vld [vmem:[#allocation4 + $0x50] sm:$0xff] }
 0x251   :  { %v3118_v14 = vpack.c.bf16 %v42_v13, %v41_v12 }
 0x252   :  { %v259_v28 = vpack.c.bf16 %v258_v27, %v258_v27 }
 0x253   :  { %2580 = vmatpush3.bf16.msra.mxu0 %v3118_v14 }
 0x254   :  { %265 = vrot.lane.b32.xlu1 %v259_v28, %s3007_s25  ;;  %2581 = vmatprep.subr.bf16.mxu0 %v3005_v21 }
 0x257   :  { %2582 = vmatpush3.bf16.msra.mxu0 %v3054_v22 }
 0x258   :  { %2583 = vmatprep.subr.bf16.mxu0 %v3005_v21 }
 0x25b   :  { %2584 = vmatpush3.bf16.msra.mxu0 %v3060_v24 }
 0x25c   :  { %2597 = vmatprep.subr.bf16.mxu0 %v3005_v21 }
 0x2c6   :  { %v266_v34 = vpop.permute.xlu1 %265 }
 0x2c7   :  { %2566 = vmatmul.mubr.msk.bf16.vlgmr.msra.gmra.mxu1 %vm267_vm2, %v266_v34 }
 0x2c8   :  { %2570 = vmatpush3.bf16.msra.mxu1 %v3067_v31  ;;  %2573 = vmatprep.mubr.msk.bf16.mxu1 %vm3006_vm1, %v3005_v21 }
 0x2c9   :  { %2571 = vmatprep.subr.bf16.mxu1 %v3005_v21 }
 0x2cc   :  { %2572 = vmatpush3.bf16.msra.mxu1 %v3071_v35 }
 0x2cd   :  { %2589 = vmatprep.subr.bf16.mxu1 %v3005_v21 }
 0x2cf   :  { %2574 = vmatmul.mubr.msk.bf16.vlgmr.msra.gmra.mxu1 %vm267_vm2, %v266_v34  ;;  %v197_v34 = vpop.f32.mrf.mxu0 }
 0x2d0   :  { %2590 = vmatpush3.bf16.msra.mxu1 %v3067_v31  ;;  %2593 = vmatprep.mubr.msk.bf16.mxu1 %vm3006_vm1, %v3005_v21 }
 0x2d1   :  { %2591 = vmatprep.subr.bf16.mxu1 %v3005_v21 }
 0x2d4   :  { %2592 = vmatpush3.bf16.msra.mxu1 %v3071_v35 }
 0x2d5   :  { %2609 = vmatprep.subr.bf16.mxu1 %v3005_v21 }
 0x387   :  { %v305_v37 = vpop.f32.mrf.mxu1 }
 0x388   :  { %v306_v38 = vadd.f32 %v3088_v36, %v305_v37  ;;  %v3171_v37 = vpop.f32.mrf.mxu0 }
 0x389   :  { %v2567_v39 = vpop.f32.mrf.mxu1 }
 0x38a   :  { %2839 = vtanh.f32 %v306_v38  ;;  %v2344_v50 = vmul.f32 -1.442695, %v306_v38  ;;  %v3173_v38 = vpop.f32.mrf.mxu0 }
 0x38b   :  { %v308_v40 = vpop.f32.mrf.mxu1 }
 0x38d   :  { %v2568_v41 = vpop.f32.mrf.mxu1 }
 0x38e   :  { %v198_v41 = vadd.f32 %v3045_v5, %v197_v34 }
 0x38f   :  { %v346_v43 = vpop.f32.mrf.mxu1 }
 0x390   :  { %v352_v44 = vadd.f32 %v346_v43, %v193_v42 }
 0x391   :  { %v2575_v45 = vpop.f32.mrf.mxu1 }
 0x392   :  { %2841 = vtanh.f32 %v352_v44  ;;  %v2343_v51 = vmul.f32 -1.442695, %v352_v44 }
 0x393   :  { %v349_v46 = vpop.f32.mrf.mxu1  ;;  %2843 = vpow2.f32 %v2344_v50 }
 0x394   :  { %2845 = vpow2.f32 %v2343_v51 }
 0x395   :  { %v2576_v47 = vpop.f32.mrf.mxu1 }
 0x397   :  { %v2840_v48 = vpop.eup %2839 }
 0x398   :  { %386 = vrot.lane.b32.xlu1 %v2840_v48, %s3004_s24 }
 0x39f   :  { %v2842_v49 = vpop.eup %2841 }
 0x3a0   :  { %362 = vrot.lane.b32.xlu0 %v2842_v49, %s3004_s24  ;;  %v2844_v52 = vpop.eup %2843 }
 0x3a1   :  { %v380_v53 = vadd.f32 1.0, %v2844_v52  ;;  %v2846_v54 = vpop.eup %2845 }
 0x3a2   :  { %v356_v55 = vadd.f32 1.0, %v2846_v54 }
 0x3a3   :  { %2847 = vrcp.f32 %v380_v53 }
 0x3a4   :  { %2849 = vrcp.f32 %v356_v55 }
 0x3b0   :  { %v2848_v56 = vpop.eup %2847 }
 0x3b1   :  { %v2850_v59 = vpop.eup %2849  ;;  %v384_v62 = vmul.f32 0.0, %v2848_v56 }
 0x3b2   :  { %v360_v1 = vmul.f32 %v2850_v59, %v3050_v17  ;;  %v90_v17 = vld [vmem:[%s3536_s0 + $0x30] sm:$0xff] }
 0x3b3   :  { %2558 = vmatprep.mubr.msk.f32.mxu0 %vm96_vm0, %v90_v17 }
 0x3b4   :  { %2559 = vmatmul.mubr.msk.f32.gmra.mxu0 %vm96_vm0, %v91_v18 }
 0x3b5   :  { %2585 = vmatprep.mubr.msk.bf16.mxu0 %vm3006_vm1, %v3005_v21 }
 0x40a   :  { %v387_v57 = vpop.permute.xlu1 %386 }
 0x40b   :  { %v389_v58 = vmul.f32 %v2848_v56, %v387_v57 }
 0x40d   :  { %391 = vrot.lane.b32.xlu1 %v389_v58, %s3004_s24 }
 0x412   :  { %v363_v60 = vpop.permute.xlu0 %362 }
 0x413   :  { %v365_v61 = vmul.f32 %v2850_v59, %v363_v60 }
 0x415   :  { %367 = vrot.lane.b32.xlu0 %v365_v61, %s3004_s24 }
 0x474   :  { %v3175_v39 = vpop.f32.mrf.mxu0 }
 0x476   :  { %v3177_v40 = vpop.f32.mrf.mxu0 }
 0x47f   :  { %v392_v63 = vpop.permute.xlu1 %391 }
 0x480   :  { %v3097_v0 = vadd.f32 %v392_v63, %v384_v62 }
 0x482   :  { %2851 = vtanh.f32 %v3097_v0 }
 0x487   :  { %v368_v2 = vpop.permute.xlu0 %367 }
 0x488   :  { %v3101_v3 = vadd.f32 %v368_v2, %v360_v1 }
 0x48a   :  { %2853 = vtanh.f32 %v3101_v3 }
 0x48f   :  { %v2852_v4 = vpop.eup %2851 }
 0x490   :  { %397 = vrot.lane.b32.xlu1 %v2852_v4, %s3004_s24 }
 0x497   :  { %v2854_v11 = vpop.eup %2853 }
 0x498   :  { %373 = vrot.lane.b32.xlu0 %v2854_v11, %s3004_s24 }
 0x502   :  { %v398_v19 = vpop.permute.xlu1 %397 }
 0x503   :  { %v3144_v20 = vmul.f32 %v2848_v56, %v398_v19 }
 0x505   :  { %410 = vrot.lane.b32.xlu1 %v3144_v20, %s3008_s13 }
 0x50a   :  { %v374_v23 = vpop.permute.xlu0 %373 }
 0x50b   :  { %v376_v25 = vmul.f32 %v2850_v59, %v374_v23 }
 0x50d   :  { %407 = vrot.lane.b32.xlu0 %v376_v25, %s3007_s25  ;;  %v460_v26 = vpack.c.bf16 %v376_v25, %v376_v25 }
 0x511   :  { %462 = vrot.lane.b32.xlu0 %v460_v26, %s3007_s25 }
 0x577   :  { %v411_v27 = vpop.permute.xlu1 %410 }
 0x57f   :  { %v408_v28 = vpop.permute.xlu0 %407 }
 0x580   :  { %v413_v29 = vsel %vm267_vm2, %v408_v28, %v411_v27  ;;  %v203_v27 = vadd.f32 %v3169_v33, %v3045_v5 }
 0x581   :  { %v414_v30 = vpack.c.bf16 %v413_v29, %v413_v29 }
 0x583   :  { %2586 = vmatmul.mubr.msk.bf16.vlgmr.msra.gmra.mxu0 %vm415_vm3, %v414_v30  ;;  %v463_v32 = vpop.permute.xlu0 %462 }
 0x584   :  { %2594 = vmatmul.mubr.msk.bf16.vlgmr.msra.gmra.mxu1 %vm267_vm2, %v463_v32  ;;  %2598 = vmatpush3.bf16.msra.mxu0 %v3108_v9 }
 0x585   :  { %2599 = vmatprep.subr.bf16.mxu0 %v3005_v21  ;;  %2610 = vmatpush3.bf16.msra.mxu1 %v3067_v31 }
 0x586   :  { %2611 = vmatprep.subr.bf16.mxu1 %v3005_v21  ;;  %2605 = vmatprep.mubr.msk.bf16.mxu0 %vm3006_vm1, %v3005_v21 }
 0x587   :  { %2613 = vmatprep.mubr.msk.bf16.mxu1 %vm3006_vm1, %v3005_v21 }
 0x588   :  { %2600 = vmatpush3.bf16.msra.mxu0 %v3118_v14 }
 0x589   :  { %2601 = vmatprep.subr.bf16.mxu0 %v3005_v21  ;;  %2612 = vmatpush3.bf16.msra.mxu1 %v3071_v35 }
 0x58a   :  { %2617 = vmatprep.subr.bf16.mxu1 %v3005_v21 }
 0x58c   :  { %2602 = vmatpush3.bf16.msra.mxu0 %v3054_v22 }
 0x58d   :  { %2603 = vmatprep.subr.bf16.mxu0 %v3005_v21 }
 0x590   :  { %2604 = vmatpush3.bf16.msra.mxu0 %v3060_v24 }
 0x591   :  { %2629 = vmatprep.subr.bf16.mxu0 %v3005_v21 }
 0x643   :  { %v453_v42 = vpop.f32.mrf.mxu0 }
 0x644   :  { %v454_v43 = vadd.f32 %v3088_v36, %v453_v42  ;;  %v501_v44 = vpop.f32.mrf.mxu1 }
 0x645   :  { %v507_v45 = vadd.f32 %v501_v44, %v198_v41  ;;  %v2587_v46 = vpop.f32.mrf.mxu0 }
 0x646   :  { %2855 = vtanh.f32 %v454_v43  ;;  %v2595_v47 = vpop.f32.mrf.mxu1  ;;  %v2348_v54 = vmul.f32 -1.442695, %v454_v43 }
 0x647   :  { %2857 = vtanh.f32 %v507_v45  ;;  %v456_v48 = vpop.f32.mrf.mxu0  ;;  %v2347_v55 = vmul.f32 -1.442695, %v507_v45 }
 0x648   :  { %v504_v49 = vpop.f32.mrf.mxu1  ;;  %2859 = vpow2.f32 %v2348_v54 }
 0x649   :  { %v2588_v50 = vpop.f32.mrf.mxu0  ;;  %2861 = vpow2.f32 %v2347_v55 }
 0x64a   :  { %v2596_v51 = vpop.f32.mrf.mxu1 }
 0x653   :  { %v2856_v52 = vpop.eup %2855 }
 0x654   :  { %v2858_v53 = vpop.eup %2857  ;;  %541 = vrot.lane.b32.xlu0 %v2856_v52, %s3004_s24 }
 0x655   :  { %517 = vrot.lane.b32.xlu1 %v2858_v53, %s3004_s24  ;;  %v2860_v56 = vpop.eup %2859 }
 0x656   :  { %v2862_v57 = vpop.eup %2861  ;;  %v535_v58 = vadd.f32 1.0, %v2860_v56 }
 0x657   :  { %v511_v59 = vadd.f32 1.0, %v2862_v57 }
 0x658   :  { %2863 = vrcp.f32 %v535_v58 }
 0x659   :  { %2865 = vrcp.f32 %v511_v59 }
 0x665   :  { %v2864_v60 = vpop.eup %2863 }
 0x666   :  { %v2866_v62 = vpop.eup %2865  ;;  %v539_v4 = vmul.f32 %v2864_v60, %v3097_v0 }
 0x667   :  { %v515_v7 = vmul.f32 %v2866_v62, %v3101_v3 }
 0x6c6   :  { %v542_v61 = vpop.permute.xlu0 %541 }
 0x6c7   :  { %v544_v63 = vmul.f32 %v2864_v60, %v542_v61  ;;  %v518_v1 = vpop.permute.xlu1 %517 }
 0x6c8   :  { %v520_v2 = vmul.f32 %v2866_v62, %v518_v1 }
 0x6c9   :  { %546 = vrot.lane.b32.xlu0 %v544_v63, %s3004_s24 }
 0x6ca   :  { %522 = vrot.lane.b32.xlu1 %v520_v2, %s3004_s24 }
 0x73b   :  { %v547_v6 = vpop.permute.xlu0 %546 }
 0x73c   :  { %v3187_v8 = vadd.f32 %v547_v6, %v539_v4  ;;  %v523_v10 = vpop.permute.xlu1 %522 }
 0x73d   :  { %v3189_v11 = vadd.f32 %v523_v10, %v515_v7 }
 0x73e   :  { %2867 = vtanh.f32 %v3187_v8 }
 0x73f   :  { %2869 = vtanh.f32 %v3189_v11 }
 0x74b   :  { %v2868_v12 = vpop.eup %2867 }
 0x74c   :  { %v2870_v13 = vpop.eup %2869  ;;  %552 = vrot.lane.b32.xlu0 %v2868_v12, %s3004_s24 }
 0x74d   :  { %528 = vrot.lane.b32.xlu1 %v2870_v13, %s3004_s24 }
 0x7be   :  { %v553_v15 = vpop.permute.xlu0 %552 }
 0x7bf   :  { %v3195_v0 = vmul.f32 %v2864_v60, %v553_v15  ;;  %v529_v16 = vpop.permute.xlu1 %528 }
 0x7c0   :  { %v531_v3 = vmul.f32 %v2866_v62, %v529_v16 }
 0x7c1   :  { %565 = vrot.lane.b32.xlu0 %v3195_v0, %s3008_s13 }
 0x7c2   :  { %562 = vrot.lane.b32.xlu1 %v531_v3, %s3007_s25  ;;  %v614_v17 = vpack.c.bf16 %v531_v3, %v531_v3 }
 0x7c6   :  { %616 = vrot.lane.b32.xlu1 %v614_v17, %s3007_s25  ;;  %v208_v17 = vadd.f32 %v3045_v5, %v3173_v38 }
 0x833   :  { %v566_v18 = vpop.permute.xlu0 %565 }
 0x834   :  { %v563_v19 = vpop.permute.xlu1 %562 }
 0x835   :  { %v568_v23 = vsel %vm267_vm2, %v563_v19, %v566_v18 }
 0x836   :  { %v569_v25 = vpack.c.bf16 %v568_v23, %v568_v23 }
 0x838   :  { %2606 = vmatmul.mubr.msk.bf16.vlgmr.msra.gmra.mxu0 %vm415_vm3, %v569_v25  ;;  %v617_v26 = vpop.permute.xlu1 %616 }
 0x839   :  { %2614 = vmatmul.mubr.msk.bf16.vlgmr.msra.gmra.mxu1 %vm267_vm2, %v617_v26  ;;  %2630 = vmatpush3.bf16.msra.mxu0 %v3067_v31 }
 0x83a   :  { %2618 = vmatpush3.bf16.msra.mxu1 %v3108_v9  ;;  %2631 = vmatprep.subr.bf16.mxu0 %v3005_v21 }
 0x83b   :  { %2619 = vmatprep.subr.bf16.mxu1 %v3005_v21  ;;  %2625 = vmatprep.mubr.msk.bf16.mxu1 %vm3006_vm1, %v3005_v21 }
 0x83c   :  { %2633 = vmatprep.mubr.msk.bf16.mxu0 %vm3006_vm1, %v3005_v21 }
 0x83d   :  { %2632 = vmatpush3.bf16.msra.mxu0 %v3071_v35 }
 0x83e   :  { %2620 = vmatpush3.bf16.msra.mxu1 %v3118_v14  ;;  %2637 = vmatprep.subr.bf16.mxu0 %v3005_v21 }
 0x83f   :  { %2621 = vmatprep.subr.bf16.mxu1 %v3005_v21 }
 0x842   :  { %2622 = vmatpush3.bf16.msra.mxu1 %v3054_v22 }
 0x843   :  { %2623 = vmatprep.subr.bf16.mxu1 %v3005_v21 }
 0x846   :  { %2624 = vmatpush3.bf16.msra.mxu1 %v3060_v24 }
 0x847   :  { %2649 = vmatprep.subr.bf16.mxu1 %v3005_v21 }
 0x8f8   :  { %v607_v28 = vpop.f32.mrf.mxu0 }
 0x8f9   :  { %v608_v29 = vadd.f32 %v3088_v36, %v607_v28  ;;  %v655_v30 = vpop.f32.mrf.mxu1 }
 0x8fa   :  { %v661_v32 = vadd.f32 %v655_v30, %v203_v27  ;;  %v2607_v34 = vpop.f32.mrf.mxu0 }
 0x8fb   :  { %2871 = vtanh.f32 %v608_v29  ;;  %v2615_v41 = vpop.f32.mrf.mxu1  ;;  %v2352_v33 = vmul.f32 -1.442695, %v608_v29 }
 0x8fc   :  { %2873 = vtanh.f32 %v661_v32  ;;  %v610_v42 = vpop.f32.mrf.mxu0  ;;  %v2351_v48 = vmul.f32 -1.442695, %v661_v32 }
 0x8fd   :  { %v658_v43 = vpop.f32.mrf.mxu1  ;;  %2875 = vpow2.f32 %v2352_v33 }
 0x8fe   :  { %v2608_v44 = vpop.f32.mrf.mxu0  ;;  %2877 = vpow2.f32 %v2351_v48 }
 0x8ff   :  { %v2616_v45 = vpop.f32.mrf.mxu1 }
 0x908   :  { %v2872_v46 = vpop.eup %2871 }
 0x909   :  { %v2874_v47 = vpop.eup %2873  ;;  %695 = vrot.lane.b32.xlu1 %v2872_v46, %s3004_s24 }
 0x90a   :  { %671 = vrot.lane.b32.xlu0 %v2874_v47, %s3004_s24  ;;  %v2876_v49 = vpop.eup %2875 }
 0x90b   :  { %v2878_v50 = vpop.eup %2877  ;;  %v689_v51 = vadd.f32 1.0, %v2876_v49 }
 0x90c   :  { %v665_v52 = vadd.f32 1.0, %v2878_v50 }
 0x90d   :  { %2879 = vrcp.f32 %v689_v51 }
 0x90e   :  { %2881 = vrcp.f32 %v665_v52 }
 0x91a   :  { %v2880_v53 = vpop.eup %2879 }
 0x91b   :  { %v2882_v55 = vpop.eup %2881  ;;  %v693_v59 = vmul.f32 %v2880_v53, %v3187_v8 }
 0x91c   :  { %v669_v61 = vmul.f32 %v2882_v55, %v3189_v11 }
 0x97b   :  { %v696_v54 = vpop.permute.xlu1 %695 }
 0x97c   :  { %v698_v56 = vmul.f32 %v2880_v53, %v696_v54  ;;  %v672_v57 = vpop.permute.xlu0 %671 }
 0x97d   :  { %v674_v58 = vmul.f32 %v2882_v55, %v672_v57 }
 0x97e   :  { %700 = vrot.lane.b32.xlu1 %v698_v56, %s3004_s24 }
 0x97f   :  { %676 = vrot.lane.b32.xlu0 %v674_v58, %s3004_s24 }
 0x9f0   :  { %v701_v60 = vpop.permute.xlu1 %700 }
 0x9f1   :  { %v3229_v62 = vadd.f32 %v701_v60, %v693_v59  ;;  %v677_v63 = vpop.permute.xlu0 %676 }
 0x9f2   :  { %v3231_v1 = vadd.f32 %v677_v63, %v669_v61 }
 0x9f3   :  { %2883 = vtanh.f32 %v3229_v62 }
 0x9f4   :  { %2885 = vtanh.f32 %v3231_v1 }
 0xa00   :  { %v2884_v2 = vpop.eup %2883 }
 0xa01   :  { %v2886_v4 = vpop.eup %2885  ;;  %706 = vrot.lane.b32.xlu1 %v2884_v2, %s3004_s24 }
 0xa02   :  { %682 = vrot.lane.b32.xlu0 %v2886_v4, %s3004_s24 }
 0xa73   :  { %v707_v6 = vpop.permute.xlu1 %706 }
 0xa74   :  { %v3237_v7 = vmul.f32 %v2880_v53, %v707_v6  ;;  %v683_v8 = vpop.permute.xlu0 %682 }
 0xa75   :  { %v685_v10 = vmul.f32 %v2882_v55, %v683_v8 }
 0xa76   :  { %719 = vrot.lane.b32.xlu1 %v3237_v7, %s3008_s13 }
 0xa77   :  { %716 = vrot.lane.b32.xlu0 %v685_v10, %s3007_s25  ;;  %v768_v11 = vpack.c.bf16 %v685_v10, %v685_v10 }
 0xa7b   :  { %770 = vrot.lane.b32.xlu0 %v768_v11, %s3007_s25  ;;  %v213_v11 = vadd.f32 %v3171_v37, %v3045_v5 }
 0xae8   :  { %v720_v12 = vpop.permute.xlu1 %719 }
 0xae9   :  { %v717_v13 = vpop.permute.xlu0 %716 }
 0xaea   :  { %v722_v15 = vsel %vm267_vm2, %v717_v13, %v720_v12 }
 0xaeb   :  { %v723_v16 = vpack.c.bf16 %v722_v15, %v722_v15 }
 0xaed   :  { %2626 = vmatmul.mubr.msk.bf16.vlgmr.msra.gmra.mxu1 %vm415_vm3, %v723_v16  ;;  %v771_v3 = vpop.permute.xlu0 %770 }
 0xaee   :  { %2634 = vmatmul.mubr.msk.bf16.vlgmr.msra.gmra.mxu0 %vm267_vm2, %v771_v3  ;;  %2650 = vmatpush3.bf16.msra.mxu1 %v3067_v31 }
 0xaef   :  { %2638 = vmatpush3.bf16.msra.mxu0 %v3108_v9  ;;  %2651 = vmatprep.subr.bf16.mxu1 %v3005_v21 }
 0xaf0   :  { %2639 = vmatprep.subr.bf16.mxu0 %v3005_v21  ;;  %2645 = vmatprep.mubr.msk.bf16.mxu0 %vm3006_vm1, %v3005_v21 }
 0xaf1   :  { %2653 = vmatprep.mubr.msk.bf16.mxu1 %vm3006_vm1, %v3005_v21 }
 0xaf2   :  { %2652 = vmatpush3.bf16.msra.mxu1 %v3071_v35 }
 0xaf3   :  { %2640 = vmatpush3.bf16.msra.mxu0 %v3118_v14  ;;  %2657 = vmatprep.subr.bf16.mxu1 %v3005_v21 }
 0xaf4   :  { %2641 = vmatprep.subr.bf16.mxu0 %v3005_v21 }
 0xaf7   :  { %2642 = vmatpush3.bf16.msra.mxu0 %v3054_v22 }
 0xaf8   :  { %2643 = vmatprep.subr.bf16.mxu0 %v3005_v21 }
 0xafb   :  { %2644 = vmatpush3.bf16.msra.mxu0 %v3060_v24 }
 0xafc   :  { %2669 = vmatprep.subr.bf16.mxu0 %v3005_v21 }
 0xbad   :  { %v761_v18 = vpop.f32.mrf.mxu1 }
 0xbae   :  { %v762_v19 = vadd.f32 %v3088_v36, %v761_v18  ;;  %v809_v23 = vpop.f32.mrf.mxu0 }
 0xbaf   :  { %v815_v25 = vadd.f32 %v809_v23, %v208_v17  ;;  %v2627_v26 = vpop.f32.mrf.mxu1 }
 0xbb0   :  { %2887 = vtanh.f32 %v762_v19  ;;  %v2635_v27 = vpop.f32.mrf.mxu0  ;;  %v2356_v38 = vmul.f32 -1.442695, %v762_v19 }
 0xbb1   :  { %2889 = vtanh.f32 %v815_v25  ;;  %v764_v28 = vpop.f32.mrf.mxu1  ;;  %v2355_v42 = vmul.f32 -1.442695, %v815_v25 }
 0xbb2   :  { %v812_v29 = vpop.f32.mrf.mxu0  ;;  %2891 = vpow2.f32 %v2356_v38 }
 0xbb3   :  { %v2628_v30 = vpop.f32.mrf.mxu1  ;;  %2893 = vpow2.f32 %v2355_v42 }
 0xbb4   :  { %v2636_v32 = vpop.f32.mrf.mxu0 }
 0xbbd   :  { %v2888_v34 = vpop.eup %2887 }
 0xbbe   :  { %v2890_v41 = vpop.eup %2889  ;;  %849 = vrot.lane.b32.xlu0 %v2888_v34, %s3004_s24 }
 0xbbf   :  { %825 = vrot.lane.b32.xlu1 %v2890_v41, %s3004_s24  ;;  %v2892_v43 = vpop.eup %2891 }
 0xbc0   :  { %v2894_v44 = vpop.eup %2893  ;;  %v843_v45 = vadd.f32 1.0, %v2892_v43 }
 0xbc1   :  { %v819_v46 = vadd.f32 1.0, %v2894_v44 }
 0xbc2   :  { %2895 = vrcp.f32 %v843_v45 }
 0xbc3   :  { %2897 = vrcp.f32 %v819_v46 }
 0xbcf   :  { %v2896_v47 = vpop.eup %2895 }
 0xbd0   :  { %v2898_v48 = vpop.eup %2897  ;;  %v847_v52 = vmul.f32 %v2896_v47, %v3229_v62 }
 0xbd1   :  { %v823_v54 = vmul.f32 %v2898_v48, %v3231_v1 }
 0xc30   :  { %v850_v33 = vpop.permute.xlu0 %849 }
 0xc31   :  { %v852_v49 = vmul.f32 %v2896_v47, %v850_v33  ;;  %v826_v50 = vpop.permute.xlu1 %825 }
 0xc32   :  { %v828_v51 = vmul.f32 %v2898_v48, %v826_v50 }
 0xc33   :  { %854 = vrot.lane.b32.xlu0 %v852_v49, %s3004_s24 }
 0xc34   :  { %830 = vrot.lane.b32.xlu1 %v828_v51, %s3004_s24 }
 0xca5   :  { %v855_v53 = vpop.permute.xlu0 %854 }
 0xca6   :  { %v3271_v55 = vadd.f32 %v855_v53, %v847_v52  ;;  %v831_v56 = vpop.permute.xlu1 %830 }
 0xca7   :  { %v3273_v57 = vadd.f32 %v831_v56, %v823_v54 }
 0xca8   :  { %2899 = vtanh.f32 %v3271_v55 }
 0xca9   :  { %2901 = vtanh.f32 %v3273_v57 }
 0xcb5   :  { %v2900_v58 = vpop.eup %2899 }
 0xcb6   :  { %v2902_v59 = vpop.eup %2901  ;;  %860 = vrot.lane.b32.xlu0 %v2900_v58, %s3004_s24 }
 0xcb7   :  { %836 = vrot.lane.b32.xlu1 %v2902_v59, %s3004_s24 }
 0xd28   :  { %v861_v60 = vpop.permute.xlu0 %860 }
 0xd29   :  { %v3279_v61 = vmul.f32 %v2896_v47, %v861_v60  ;;  %v837_v62 = vpop.permute.xlu1 %836 }
 0xd2a   :  { %v839_v63 = vmul.f32 %v2898_v48, %v837_v62 }
 0xd2b   :  { %873 = vrot.lane.b32.xlu0 %v3279_v61, %s3008_s13 }
 0xd2c   :  { %870 = vrot.lane.b32.xlu1 %v839_v63, %s3007_s25  ;;  %v922_v1 = vpack.c.bf16 %v839_v63, %v839_v63 }
 0xd30   :  { %924 = vrot.lane.b32.xlu1 %v922_v1, %s3007_s25 }
 0xd9d   :  { %v874_v2 = vpop.permute.xlu0 %873 }
 0xd9e   :  { %v871_v4 = vpop.permute.xlu1 %870 }
 0xd9f   :  { %v876_v6 = vsel %vm267_vm2, %v871_v4, %v874_v2 }
 0xda0   :  { %v877_v8 = vpack.c.bf16 %v876_v6, %v876_v6 }
 0xda2   :  { %v925_v10 = vpop.permute.xlu1 %924  ;;  %2646 = vmatmul.mubr.msk.bf16.vlgmr.msra.gmra.mxu0 %vm415_vm3, %v877_v8 }
 0xda3   :  { %2654 = vmatmul.mubr.msk.bf16.vlgmr.msra.gmra.mxu1 %vm267_vm2, %v925_v10  ;;  %2670 = vmatpush3.bf16.msra.mxu0 %v3067_v31 }
 0xda4   :  { %2658 = vmatpush3.bf16.msra.mxu1 %v3108_v9  ;;  %2671 = vmatprep.subr.bf16.mxu0 %v3005_v21 }
 0xda5   :  { %2659 = vmatprep.subr.bf16.mxu1 %v3005_v21  ;;  %2665 = vmatprep.mubr.msk.bf16.mxu1 %vm3006_vm1, %v3005_v21 }
 0xda6   :  { %2673 = vmatprep.mubr.msk.bf16.mxu0 %vm3006_vm1, %v3005_v21 }
 0xda7   :  { %2672 = vmatpush3.bf16.msra.mxu0 %v3071_v35 }
 0xda8   :  { %2660 = vmatpush3.bf16.msra.mxu1 %v3118_v14  ;;  %2677 = vmatprep.subr.bf16.mxu0 %v3005_v21 }
 0xda9   :  { %2661 = vmatprep.subr.bf16.mxu1 %v3005_v21 }
 0xdac   :  { %2662 = vmatpush3.bf16.msra.mxu1 %v3054_v22 }
 0xdad   :  { %2663 = vmatprep.subr.bf16.mxu1 %v3005_v21 }
 0xdb0   :  { %2664 = vmatpush3.bf16.msra.mxu1 %v3060_v24 }
 0xdb1   :  { %2689 = vmatprep.subr.bf16.mxu1 %v3005_v21 }
 0xe62   :  { %v915_v12 = vpop.f32.mrf.mxu0 }
 0xe63   :  { %v916_v13 = vadd.f32 %v3088_v36, %v915_v12  ;;  %v963_v15 = vpop.f32.mrf.mxu1 }
 0xe64   :  { %v969_v16 = vadd.f32 %v963_v15, %v213_v11  ;;  %v2647_v3 = vpop.f32.mrf.mxu0 }
 0xe65   :  { %2903 = vtanh.f32 %v916_v13  ;;  %v2655_v17 = vpop.f32.mrf.mxu1  ;;  %v2360_v37 = vmul.f32 -1.442695, %v916_v13 }
 0xe66   :  { %2905 = vtanh.f32 %v969_v16  ;;  %v918_v18 = vpop.f32.mrf.mxu0  ;;  %v2359_v28 = vmul.f32 -1.442695, %v969_v16 }
 0xe67   :  { %v966_v19 = vpop.f32.mrf.mxu1  ;;  %2907 = vpow2.f32 %v2360_v37 }
 0xe68   :  { %v2648_v23 = vpop.f32.mrf.mxu0  ;;  %2909 = vpow2.f32 %v2359_v28 }
 0xe69   :  { %v2656_v25 = vpop.f32.mrf.mxu1 }
 0xe72   :  { %v2904_v26 = vpop.eup %2903 }
 0xe73   :  { %v2906_v27 = vpop.eup %2905  ;;  %1003 = vrot.lane.b32.xlu1 %v2904_v26, %s3004_s24 }
 0xe74   :  { %979 = vrot.lane.b32.xlu0 %v2906_v27, %s3004_s24  ;;  %v2908_v29 = vpop.eup %2907 }
 0xe75   :  { %v2910_v30 = vpop.eup %2909  ;;  %v997_v32 = vadd.f32 1.0, %v2908_v29 }
 0xe76   :  { %v973_v34 = vadd.f32 1.0, %v2910_v30 }
 0xe77   :  { %2911 = vrcp.f32 %v997_v32 }
 0xe78   :  { %2913 = vrcp.f32 %v973_v34 }
 0xe84   :  { %v2912_v41 = vpop.eup %2911 }
 0xe85   :  { %v2914_v42 = vpop.eup %2913  ;;  %v1001_v46 = vmul.f32 %v2912_v41, %v3271_v55 }
 0xe86   :  { %v977_v33 = vmul.f32 %v2914_v42, %v3273_v57 }
 0xee5   :  { %v1004_v38 = vpop.permute.xlu1 %1003 }
 0xee6   :  { %v1006_v43 = vmul.f32 %v2912_v41, %v1004_v38  ;;  %v980_v44 = vpop.permute.xlu0 %979 }
 0xee7   :  { %v982_v45 = vmul.f32 %v2914_v42, %v980_v44 }
 0xee8   :  { %1008 = vrot.lane.b32.xlu1 %v1006_v43, %s3004_s24 }
 0xee9   :  { %984 = vrot.lane.b32.xlu0 %v982_v45, %s3004_s24 }
 0xf5a   :  { %v1009_v47 = vpop.permute.xlu1 %1008 }
 0xf5b   :  { %v3313_v48 = vadd.f32 %v1009_v47, %v1001_v46  ;;  %v985_v49 = vpop.permute.xlu0 %984 }
 0xf5c   :  { %v3315_v50 = vadd.f32 %v985_v49, %v977_v33 }
 0xf5d   :  { %2915 = vtanh.f32 %v3313_v48 }
 0xf5e   :  { %2917 = vtanh.f32 %v3315_v50 }
 0xf6a   :  { %v2916_v51 = vpop.eup %2915 }
 0xf6b   :  { %v2918_v52 = vpop.eup %2917  ;;  %1014 = vrot.lane.b32.xlu1 %v2916_v51, %s3004_s24 }
 0xf6c   :  { %990 = vrot.lane.b32.xlu0 %v2918_v52, %s3004_s24 }
 0xfdd   :  { %v1015_v53 = vpop.permute.xlu1 %1014 }
 0xfde   :  { %v3321_v54 = vmul.f32 %v2912_v41, %v1015_v53  ;;  %v991_v55 = vpop.permute.xlu0 %990  ;;  %v2977_v53 = vld [vmem:[%s3538_s2] ss:$0 sm:$0xff] }
 0xfdf   :  { %v993_v56 = vmul.f32 %v2914_v42, %v991_v55 }
 0xfe0   :  { %1027 = vrot.lane.b32.xlu1 %v3321_v54, %s3008_s13 }
 0xfe1   :  { %1024 = vrot.lane.b32.xlu0 %v993_v56, %s3007_s25  ;;  %v1076_v57 = vpack.c.bf16 %v993_v56, %v993_v56 }
 0xfe5   :  { %1078 = vrot.lane.b32.xlu0 %v1076_v57, %s3007_s25 }
0x1052   :  { %v1028_v58 = vpop.permute.xlu1 %1027 }
0x1053   :  { %v1025_v59 = vpop.permute.xlu0 %1024 }
0x1054   :  { %v1030_v60 = vsel %vm267_vm2, %v1025_v59, %v1028_v58 }
0x1055   :  { %v1031_v62 = vpack.c.bf16 %v1030_v60, %v1030_v60 }
0x1057   :  { %2666 = vmatmul.mubr.msk.bf16.vlgmr.msra.gmra.mxu1 %vm415_vm3, %v1031_v62  ;;  %v1079_v63 = vpop.permute.xlu0 %1078 }
0x1058   :  { %2674 = vmatmul.mubr.msk.bf16.vlgmr.msra.gmra.mxu0 %vm267_vm2, %v1079_v63  ;;  %2690 = vmatpush3.bf16.msra.mxu1 %v3067_v31  ;;  %v218_v31 = vadd.f32 %v3045_v5, %v3177_v40 }
0x1059   :  { %2678 = vmatpush3.bf16.msra.mxu0 %v3108_v9  ;;  %2691 = vmatprep.subr.bf16.mxu1 %v3005_v21 }
0x105a   :  { %2679 = vmatprep.subr.bf16.mxu0 %v3005_v21  ;;  %2685 = vmatprep.mubr.msk.bf16.mxu0 %vm3006_vm1, %v3005_v21 }
0x105b   :  { %2693 = vmatprep.mubr.msk.bf16.mxu1 %vm3006_vm1, %v3005_v21 }
0x105c   :  { %2692 = vmatpush3.bf16.msra.mxu1 %v3071_v35 }
0x105d   :  { %2680 = vmatpush3.bf16.msra.mxu0 %v3118_v14  ;;  %2697 = vmatprep.subr.bf16.mxu1 %v3005_v21 }
0x105e   :  { %2681 = vmatprep.subr.bf16.mxu0 %v3005_v21 }
0x1061   :  { %2682 = vmatpush3.bf16.msra.mxu0 %v3054_v22 }
0x1062   :  { %2683 = vmatprep.subr.bf16.mxu0 %v3005_v21 }
0x1065   :  { %2684 = vmatpush3.bf16.msra.mxu0 %v3060_v24 }
0x1066   :  { %2709 = vmatprep.subr.mxu0 %v3005_v21 }
0x1117   :  { %v1069_v1 = vpop.f32.mrf.mxu1 }
0x1118   :  { %v1070_v35 = vadd.f32 %v3088_v36, %v1069_v1  ;;  %v1117_v2 = vpop.f32.mrf.mxu0 }
0x1119   :  { %v1123_v4 = vadd.f32 %v1117_v2, %v218_v31  ;;  %v2667_v6 = vpop.f32.mrf.mxu1 }
0x111a   :  { %2919 = vtanh.f32 %v1070_v35  ;;  %v2675_v8 = vpop.f32.mrf.mxu0  ;;  %v2364_v5 = vmul.f32 -1.442695, %v1070_v35 }
0x111b   :  { %2921 = vtanh.f32 %v1123_v4  ;;  %v1072_v10 = vpop.f32.mrf.mxu1  ;;  %v2363_v40 = vmul.f32 -1.442695, %v1123_v4 }
0x111c   :  { %v1120_v11 = vpop.f32.mrf.mxu0  ;;  %2923 = vpow2.f32 %v2364_v5 }
0x111d   :  { %v2668_v12 = vpop.f32.mrf.mxu1  ;;  %2925 = vpow2.f32 %v2363_v40 }
0x111e   :  { %v2676_v13 = vpop.f32.mrf.mxu0 }
0x1127   :  { %v2920_v15 = vpop.eup %2919 }
0x1128   :  { %v2922_v16 = vpop.eup %2921  ;;  %1157 = vrot.lane.b32.xlu0 %v2920_v15, %s3004_s24 }
0x1129   :  { %1133 = vrot.lane.b32.xlu1 %v2922_v16, %s3004_s24  ;;  %v2924_v3 = vpop.eup %2923 }
0x112a   :  { %v2926_v17 = vpop.eup %2925  ;;  %v1151_v18 = vadd.f32 1.0, %v2924_v3 }
0x112b   :  { %v1127_v19 = vadd.f32 1.0, %v2926_v17 }
0x112c   :  { %2927 = vrcp.f32 %v1151_v18 }
0x112d   :  { %2929 = vrcp.f32 %v1127_v19 }
0x1139   :  { %v2928_v23 = vpop.eup %2927 }
0x113a   :  { %v2930_v26 = vpop.eup %2929  ;;  %v1155_v29 = vmul.f32 %v2928_v23, %v3313_v48 }
0x113b   :  { %v1131_v32 = vmul.f32 %v2930_v26, %v3315_v50 }
0x119a   :  { %v1158_v25 = vpop.permute.xlu0 %1157 }
0x119b   :  { %v1160_v27 = vmul.f32 %v2928_v23, %v1158_v25  ;;  %v1134_v37 = vpop.permute.xlu1 %1133 }
0x119c   :  { %v1136_v28 = vmul.f32 %v2930_v26, %v1134_v37 }
0x119d   :  { %1162 = vrot.lane.b32.xlu0 %v1160_v27, %s3004_s24 }
0x119e   :  { %1138 = vrot.lane.b32.xlu1 %v1136_v28, %s3004_s24 }
0x120f   :  { %v1163_v30 = vpop.permute.xlu0 %1162 }
0x1210   :  { %v3355_v34 = vadd.f32 %v1163_v30, %v1155_v29  ;;  %v1139_v41 = vpop.permute.xlu1 %1138 }
0x1211   :  { %v3357_v38 = vadd.f32 %v1139_v41, %v1131_v32 }
0x1212   :  { %2931 = vtanh.f32 %v3355_v34 }
0x1213   :  { %2933 = vtanh.f32 %v3357_v38 }
0x121f   :  { %v2932_v42 = vpop.eup %2931 }
0x1220   :  { %v2934_v43 = vpop.eup %2933  ;;  %1168 = vrot.lane.b32.xlu0 %v2932_v42, %s3004_s24 }
0x1221   :  { %1144 = vrot.lane.b32.xlu1 %v2934_v43, %s3004_s24 }
0x1292   :  { %v1169_v44 = vpop.permute.xlu0 %1168 }
0x1293   :  { %v3363_v45 = vmul.f32 %v2928_v23, %v1169_v44  ;;  %v1145_v46 = vpop.permute.xlu1 %1144 }
0x1294   :  { %v1147_v47 = vmul.f32 %v2930_v26, %v1145_v46 }
0x1295   :  { %1181 = vrot.lane.b32.xlu0 %v3363_v45, %s3008_s13 }
0x1296   :  { %1178 = vrot.lane.b32.xlu1 %v1147_v47, %s3007_s25  ;;  %v1230_v33 = vpack.c.bf16 %v1147_v47, %v1147_v47 }
0x129a   :  { %1232 = vrot.lane.b32.xlu1 %v1230_v33, %s3007_s25 }
0x1307   :  { %v1182_v48 = vpop.permute.xlu0 %1181 }
0x1308   :  { %v1179_v49 = vpop.permute.xlu1 %1178 }
0x1309   :  { %v1184_v50 = vsel %vm267_vm2, %v1179_v49, %v1182_v48 }
0x130a   :  { %v1185_v51 = vpack.c.bf16 %v1184_v50, %v1184_v50 }
0x130c   :  { %v1233_v52 = vpop.permute.xlu1 %1232  ;;  %2686 = vmatmul.mubr.msk.bf16.vlgmr.msra.gmra.mxu0 %vm415_vm3, %v1185_v51 }
0x130d   :  { %2694 = vmatmul.mubr.msk.bf16.vlgmr.msra.gmra.mxu1 %vm267_vm2, %v1233_v52  ;;  %2717 = vmatprep.mubr.msk.f32.mxu0 %vm3006_vm1, %v3005_v21 }
0x130e   :  { %2698 = vmatpush3.bf16.msra.mxu1 %v3108_v9  ;;  %2705 = vmatprep.mubr.msk.bf16.mxu1 %vm3006_vm1, %v3005_v21  ;;  %v223_v9 = vadd.f32 %v2977_v53, %v3175_v39 }
0x130f   :  { %2699 = vmatprep.subr.bf16.mxu1 %v3005_v21 }
0x1312   :  { %2700 = vmatpush3.bf16.msra.mxu1 %v3118_v14 }
0x1313   :  { %2701 = vmatprep.subr.bf16.mxu1 %v3005_v21 }
0x1316   :  { %2702 = vmatpush3.bf16.msra.mxu1 %v3054_v22 }
0x1317   :  { %2703 = vmatprep.subr.bf16.mxu1 %v3005_v21 }
0x131a   :  { %2704 = vmatpush3.bf16.msra.mxu1 %v3060_v24 }
0x13cc   :  { %v1223_v55 = vpop.f32.mrf.mxu0 }
0x13cd   :  { %v1224_v56 = vadd.f32 %v3088_v36, %v1223_v55  ;;  %v1271_v57 = vpop.f32.mrf.mxu1  ;;  %v60_v55 = vld [vmem:[#allocation4 + $0xc8] sm:$0xff] }
0x13ce   :  { %v1277_v58 = vadd.f32 %v1271_v57, %v223_v9  ;;  %v2687_v14 = vpop.f32.mrf.mxu0  ;;  %2740 = vmatprep.subr.mxu1 %v60_v55  ;;  %v58_v57 = vld [vmem:[#allocation4 + $0xb8] sm:$0xff] }
0x13cf   :  { %2935 = vtanh.f32 %v1224_v56  ;;  %v2695_v59 = vpop.f32.mrf.mxu1  ;;  %v2368_v39 = vmul.f32 -1.442695, %v1224_v56  ;;  %v59_v56 = vld [vmem:[#allocation4 + $0xc0] sm:$0xff]  ;;  %v57_v14 = vld [vmem:[#allocation4 + $0xb0] sm:$0xff] }
0x13d0   :  { %2937 = vtanh.f32 %v1277_v58  ;;  %v1226_v22 = vpop.f32.mrf.mxu0  ;;  %v2367_v1 = vmul.f32 -1.442695, %v1277_v58  ;;  %v52_v59 = vld [vmem:[#allocation4 + $0x88] sm:$0xff] }
0x13d1   :  { %v1274_v60 = vpop.f32.mrf.mxu1  ;;  %2939 = vpow2.f32 %v2368_v39  ;;  %v51_v22 = vld [vmem:[#allocation4 + $0x80] sm:$0xff]  ;;  %2710 = vmatpush3.msra.mxu0 %v52_v59 }
0x13d2   :  { %v2688_v62 = vpop.f32.mrf.mxu0  ;;  %2941 = vpow2.f32 %v2367_v1  ;;  %2711 = vmatprep.subr.mxu0 %v3005_v21  ;;  %v50_v60 = vld [vmem:[#allocation4 + $0x78] sm:$0xff] }
0x13d3   :  { %v2696_v63 = vpop.f32.mrf.mxu1  ;;  %2712 = vmatpush3.msra.mxu0 %v51_v22  ;;  %v49_v62 = vld [vmem:[#allocation4 + $0x70] sm:$0xff] }
0x13d4   :  { %2713 = vmatprep.subr.mxu0 %v3005_v21  ;;  %v56_v63 = vld [vmem:[#allocation4 + $0xa8] sm:$0xff] }
0x13d5   :  { %2714 = vmatpush3.msra.mxu0 %v50_v60 }
0x13d6   :  { %2715 = vmatprep.subr.mxu0 %v3005_v21 }
0x13d7   :  { %2716 = vmatpush3.msra.mxu0 %v49_v62 }
0x13d8   :  { %2720 = vmatprep.subr.mxu0 %v56_v63 }
0x13dc   :  { %v2936_v24 = vpop.eup %2935 }
0x13dd   :  { %v2938_v31 = vpop.eup %2937  ;;  %1311 = vrot.lane.b32.xlu1 %v2936_v24, %s3004_s24 }
0x13de   :  { %1287 = vrot.lane.b32.xlu0 %v2938_v31, %s3004_s24  ;;  %v2940_v36 = vpop.eup %2939 }
0x13df   :  { %v2942_v35 = vpop.eup %2941  ;;  %v1305_v2 = vadd.f32 1.0, %v2940_v36 }
0x13e0   :  { %v1281_v4 = vadd.f32 1.0, %v2942_v35 }
0x13e1   :  { %2943 = vrcp.f32 %v1305_v2 }
0x13e2   :  { %2945 = vrcp.f32 %v1281_v4  ;;  %v53_v4 = vld [vmem:[#allocation4 + $0x90] sm:$0xff] }
0x13ee   :  { %v2944_v6 = vpop.eup %2943 }
0x13ef   :  { %v2946_v10 = vpop.eup %2945  ;;  %v1309_v15 = vmul.f32 %v2944_v6, %v3355_v34  ;;  %v2978_v34 = vld [vmem:[%s3538_s2 + $0x1] ss:$0 sm:$0xff] }
0x13f0   :  { %v1285_v5 = vmul.f32 %v2946_v10, %v3357_v38 }
0x144f   :  { %v1312_v8 = vpop.permute.xlu1 %1311 }
0x1450   :  { %v1314_v11 = vmul.f32 %v2944_v6, %v1312_v8  ;;  %v1288_v12 = vpop.permute.xlu0 %1287 }
0x1451   :  { %v1290_v13 = vmul.f32 %v2946_v10, %v1288_v12 }
0x1452   :  { %1316 = vrot.lane.b32.xlu1 %v1314_v11, %s3004_s24 }
0x1453   :  { %1292 = vrot.lane.b32.xlu0 %v1290_v13, %s3004_s24 }
0x14c4   :  { %v1317_v16 = vpop.permute.xlu1 %1316 }
0x14c5   :  { %v1319_v40 = vadd.f32 %v1317_v16, %v1309_v15  ;;  %v1293_v3 = vpop.permute.xlu0 %1292  ;;  %v67_v16 = vld [vmem:[#allocation4 + $0x100] sm:$0xff] }
0x14c6   :  { %v1295_v17 = vadd.f32 %v1293_v3, %v1285_v5  ;;  %v66_v5 = vld [vmem:[#allocation4 + $0xf8] sm:$0xff] }
0x14c7   :  { %2947 = vtanh.f32 %v1319_v40 }
0x14c8   :  { %2949 = vtanh.f32 %v1295_v17 }
0x14d4   :  { %v2948_v18 = vpop.eup %2947 }
0x14d5   :  { %v2950_v19 = vpop.eup %2949  ;;  %1322 = vrot.lane.b32.xlu1 %v2948_v18, %s3004_s24  ;;  %v2373_v18 = vld [vmem:[%s3538_s2 + $0x3] ss:$0 sm:$0xff] }
0x14d6   :  { %1298 = vrot.lane.b32.xlu0 %v2950_v19, %s3004_s24  ;;  %v2371_v19 = vld [vmem:[%s3538_s2 + $0x2] ss:$0 sm:$0xff] }
0x1547   :  { %v1323_v23 = vpop.permute.xlu1 %1322 }
0x1548   :  { %v3396_v25 = vmul.f32 %v2944_v6, %v1323_v23  ;;  %v1299_v26 = vpop.permute.xlu0 %1298  ;;  %v68_v6 = vld [vmem:[#allocation4 + $0x108] sm:$0xff] }
0x1549   :  { %v1301_v27 = vmul.f32 %v2946_v10, %v1299_v26 }
0x154a   :  { %1335 = vrot.lane.b32.xlu1 %v3396_v25, %s3008_s13 }
0x154b   :  { %1332 = vrot.lane.b32.xlu0 %v1301_v27, %s3007_s25 }
0x15bc   :  { %v1336_v37 = vpop.permute.xlu1 %1335 }
0x15bd   :  { %v1333_v28 = vpop.permute.xlu0 %1332 }
0x15be   :  { %v1338_v29 = vsel %vm267_vm2, %v1333_v28, %v1336_v37 }
0x15bf   :  { %v1339_v30 = vpack.c.bf16 %v1338_v29, %v1338_v29 }
0x15c1   :  { %2706 = vmatmul.mubr.msk.bf16.vlgmr.msra.gmra.mxu1 %vm415_vm3, %v1339_v30 }
0x15c2   :  { %2741 = vmatpush3.msra.mxu1 %v60_v55  ;;  %v69_v55 = vld [vmem:[#allocation4 + $0x110] sm:$0xff] }
0x15c3   :  { %2742 = vmatprep.subr.mxu1 %v59_v56 }
0x15c4   :  { %2743 = vmatpush3.msra.mxu1 %v59_v56 }
0x15c5   :  { %2744 = vmatprep.subr.mxu1 %v58_v57 }
0x15c6   :  { %2745 = vmatpush3.msra.mxu1 %v58_v57 }
0x15c7   :  { %2746 = vmatprep.subr.mxu1 %v57_v14 }
0x15c8   :  { %2747 = vmatpush3.msra.mxu1 %v57_v14 }
0x15c9   :  { %2780 = vmatprep.subr.mxu1 %v69_v55 }
0x1681   :  { %v1377_v32 = vpop.f32.mrf.mxu1 }
0x1682   :  { %v1378_v41 = vadd.f32 %v2978_v34, %v1377_v32 }
0x1683   :  { %v2707_v38 = vpop.f32.mrf.mxu1 }
0x1684   :  { %2951 = vtanh.f32 %v1378_v41  ;;  %v2370_v46 = vmul.f32 -1.442695, %v1378_v41 }
0x1685   :  { %v1380_v42 = vpop.f32.mrf.mxu1 }
0x1686   :  { %2953 = vpow2.f32 %v2370_v46 }
0x1687   :  { %v2708_v43 = vpop.f32.mrf.mxu1 }
0x1691   :  { %v2952_v44 = vpop.eup %2951 }
0x1692   :  { %1392 = vrot.lane.b32.xlu0 %v2952_v44, %s3004_s24 }
0x1693   :  { %v2954_v47 = vpop.eup %2953 }
0x1694   :  { %v1386_v33 = vadd.f32 1.0, %v2954_v47 }
0x1696   :  { %2955 = vrcp.f32 %v1386_v33 }
0x16a3   :  { %v2956_v48 = vpop.eup %2955 }
0x16a4   :  { %v1390_v51 = vmul.f32 %v2956_v48, %v1319_v40  ;;  %v65_v40 = vld [vmem:[#allocation4 + $0xf0] sm:$0xff] }
0x1704   :  { %v1393_v49 = vpop.permute.xlu0 %1392 }
0x1705   :  { %v1395_v50 = vmul.f32 %v2956_v48, %v1393_v49 }
0x1707   :  { %1397 = vrot.lane.b32.xlu1 %v1395_v50, %s3004_s24 }
0x170b   :  { %402 = vrot.lane.b32.xlu1 %v3144_v20, %s3007_s25 }
0x1779   :  { %v1398_v52 = vpop.permute.xlu1 %1397 }
0x177a   :  { %v1400_v53 = vadd.f32 %v1398_v52, %v1390_v51 }
0x177c   :  { %2957 = vtanh.f32 %v1400_v53 }
0x177d   :  { %v403_v9 = vpop.permute.xlu1 %402 }
0x177e   :  { %405 = vst.msk [vmem:[#allocation3] sm:$0xff] %vm267_vm2, %v403_v9 }
0x1785   :  { %v1412_v58 = vld [vmem:[#allocation3] sm:$0xff] }
0x1786   :  { %2748 = vmatprep.mubr.msk.f32.mxu1 %vm267_vm2, %v1412_v58 }
0x1789   :  { %v2958_v20 = vpop.eup %2957 }
0x178a   :  { %1403 = vrot.lane.b32.xlu0 %v2958_v20, %s3004_s24 }
0x178e   :  { %557 = vrot.lane.b32.xlu0 %v3195_v0, %s3007_s25 }
0x1792   :  { %711 = vrot.lane.b32.xlu0 %v3237_v7, %s3007_s25 }
0x1796   :  { %1019 = vrot.lane.b32.xlu0 %v3321_v54, %s3007_s25 }
0x179a   :  { %1327 = vrot.lane.b32.xlu0 %v3396_v25, %s3007_s25 }
0x17fc   :  { %v1404_v0 = vpop.permute.xlu0 %1403 }
0x17fd   :  { %v1406_v24 = vmul.f32 %v2956_v48, %v1404_v0 }
0x17ff   :  { %1408 = vrot.lane.b32.xlu1 %v1406_v24, %s3007_s25 }
0x1800   :  { %v558_v31 = vpop.permute.xlu0 %557 }
0x1801   :  { %560 = vst.msk [vmem:[#allocation3 + $0x8] sm:$0xff] %vm267_vm2, %v558_v31 }
0x1803   :  { %865 = vrot.lane.b32.xlu1 %v3279_v61, %s3007_s25  ;;  %v55_v61 = vld [vmem:[#allocation4 + $0xa0] sm:$0xff] }
0x1804   :  { %v712_v7 = vpop.permute.xlu0 %711 }
0x1805   :  { %714 = vst.msk [vmem:[#allocation3 + $0x10] sm:$0xff] %vm267_vm2, %v712_v7 }
0x1807   :  { %1173 = vrot.lane.b32.xlu1 %v3363_v45, %s3007_s25  ;;  %v54_v45 = vld [vmem:[#allocation4 + $0x98] sm:$0xff] }
0x1808   :  { %v1020_v54 = vpop.permute.xlu0 %1019  ;;  %v1413_v39 = vld [vmem:[#allocation3 + $0x8] sm:$0xff] }
0x1809   :  { %1022 = vst.msk [vmem:[#allocation3 + $0x20] sm:$0xff] %vm267_vm2, %v1020_v54  ;;  %2749 = vmatmul.mubr.msk.f32.vlgmr.msra.gmra.mxu1 %vm267_vm2, %v1413_v39 }
0x180a   :  { %2781 = vmatpush3.msra.mxu1 %v69_v55 }
0x180b   :  { %2805 = vmatprep.subr.mxu1 %v3005_v21 }
0x180c   :  { %v1328_v1 = vpop.permute.xlu0 %1327  ;;  %v1414_v36 = vld [vmem:[#allocation3 + $0x10] sm:$0xff] }
0x180d   :  { %1330 = vst.msk [vmem:[#allocation3 + $0x30] sm:$0xff] %vm267_vm2, %v1328_v1  ;;  %2751 = vmatprep.mubr.msk.f32.mxu1 %vm267_vm2, %v1414_v36 }
0x1810   :  { %v1416_v11 = vld [vmem:[#allocation3 + $0x20] sm:$0xff] }
0x1814   :  { %v1418_v13 = vld [vmem:[#allocation3 + $0x30] sm:$0xff] }
0x1871   :  { %v1409_v35 = vpop.permute.xlu1 %1408 }
0x1872   :  { %1411 = vst.msk [vmem:[#allocation3 + $0x38] sm:$0xff] %vm267_vm2, %v1409_v35  ;;  %2718 = vmatmul.mubr.msk.f32.vlgmr.msra.gmra.mxu0 %vm267_vm2, %v1409_v35 }
0x1873   :  { %2721 = vmatpush3.msra.mxu0 %v56_v63  ;;  %2728 = vmatprep.mubr.msk.f32.mxu0 %vm267_vm2, %v1412_v58 }
0x1874   :  { %2722 = vmatprep.subr.mxu0 %v55_v61 }
0x1875   :  { %2723 = vmatpush3.msra.mxu0 %v55_v61  ;;  %v866_v2 = vpop.permute.xlu1 %865 }
0x1876   :  { %2724 = vmatprep.subr.mxu0 %v54_v45  ;;  %868 = vst.msk [vmem:[#allocation3 + $0x18] sm:$0xff] %vm267_vm2, %v866_v2 }
0x1877   :  { %2725 = vmatpush3.msra.mxu0 %v54_v45 }
0x1878   :  { %2726 = vmatprep.subr.mxu0 %v53_v4 }
0x1879   :  { %2727 = vmatpush3.msra.mxu0 %v53_v4  ;;  %v1174_v8 = vpop.permute.xlu1 %1173  ;;  %v1419_v15 = vld [vmem:[#allocation3 + $0x38] sm:$0xff] }
0x187a   :  { %1176 = vst.msk [vmem:[#allocation3 + $0x28] sm:$0xff] %vm267_vm2, %v1174_v8  ;;  %2729 = vmatmul.mubr.msk.f32.vlgmr.msra.gmra.mxu0 %vm267_vm2, %v1413_v39  ;;  %2760 = vmatprep.subr.mxu0 %v68_v6 }
0x187b   :  { %2731 = vmatprep.mubr.msk.f32.mxu0 %vm267_vm2, %v1414_v36  ;;  %2761 = vmatpush3.msra.mxu0 %v68_v6 }
0x187c   :  { %2762 = vmatprep.subr.mxu0 %v67_v16 }
0x187d   :  { %v1415_v10 = vld [vmem:[#allocation3 + $0x18] sm:$0xff]  ;;  %2763 = vmatpush3.msra.mxu0 %v67_v16 }
0x187e   :  { %2732 = vmatmul.mubr.msk.f32.gmra.mxu0 %vm267_vm2, %v1415_v10  ;;  %2752 = vmatmul.mubr.msk.f32.gmra.mxu1 %vm267_vm2, %v1415_v10 }
0x187f   :  { %2734 = vmatprep.mubr.msk.f32.mxu0 %vm267_vm2, %v1416_v11  ;;  %2754 = vmatprep.mubr.msk.f32.mxu1 %vm267_vm2, %v1416_v11 }
0x1880   :  { %2764 = vmatprep.subr.mxu0 %v66_v5 }
0x1881   :  { %v1417_v12 = vld [vmem:[#allocation3 + $0x28] sm:$0xff]  ;;  %2765 = vmatpush3.msra.mxu0 %v66_v5 }
0x1882   :  { %2735 = vmatmul.mubr.msk.f32.gmra.mxu0 %vm267_vm2, %v1417_v12  ;;  %2755 = vmatmul.mubr.msk.f32.gmra.mxu1 %vm267_vm2, %v1417_v12 }
0x1883   :  { %2737 = vmatprep.mubr.msk.f32.mxu0 %vm267_vm2, %v1418_v13  ;;  %2757 = vmatprep.mubr.msk.f32.mxu1 %vm267_vm2, %v1418_v13 }
0x1884   :  { %2766 = vmatprep.subr.mxu0 %v65_v40 }
0x1885   :  { %2767 = vmatpush3.msra.mxu0 %v65_v40 }
0x1886   :  { %2738 = vmatmul.mubr.msk.f32.gmra.mxu0 %vm267_vm2, %v1419_v15  ;;  %2758 = vmatmul.mubr.msk.f32.gmra.mxu1 %vm267_vm2, %v1419_v15 }
0x1887   :  { %2794 = vmatprep.subr.mxu0 %v3005_v21 }
0x1932   :  { %v1492_v3 = vpop.f32.mrf.mxu0 }
0x1933   :  { %v1493_v27 = vadd.f32 %v2371_v19, %v1492_v3 }
0x1934   :  { %v2719_v17 = vpop.f32.mrf.mxu0 }
0x193a   :  { %v2730_v23 = vpop.f32.mrf.mxu0 }
0x193b   :  { %v1596_v25 = vadd.f32 %v2730_v23, %v2373_v18 }
0x193c   :  { %v1590_v26 = vpop.f32.mrf.mxu0 }
0x193d   :  { %v1591_v37 = vadd.f32 %v2373_v18, %v1590_v26  ;;  %v1739_v30 = vmul.f32 %v1596_v25, %v1493_v27 }
0x193e   :  { %v2733_v28 = vpop.f32.mrf.mxu0 }
0x193f   :  { %v1738_v29 = vmul.f32 %v1591_v37, %v1493_v27  ;;  %v1606_v32 = vadd.f32 %v2733_v28, %v2373_v18 }
0x1940   :  { %v1600_v34 = vpop.f32.mrf.mxu0 }
0x1941   :  { %v1601_v41 = vadd.f32 %v2373_v18, %v1600_v34  ;;  %2768 = vmatprep.mubr.msk.f32.mxu0 %vm267_vm2, %v1738_v29  ;;  %v1741_v43 = vmul.f32 %v1606_v32, %v1493_v27 }
0x1942   :  { %2769 = vmatmul.mubr.msk.f32.vlgmr.msra.gmra.mxu0 %vm267_vm2, %v1739_v30  ;;  %v2736_v38 = vpop.f32.mrf.mxu0 }
0x1943   :  { %v1740_v42 = vmul.f32 %v1601_v41, %v1493_v27  ;;  %v1616_v44 = vadd.f32 %v2736_v38, %v2373_v18 }
0x1944   :  { %v1610_v46 = vpop.f32.mrf.mxu0 }
0x1945   :  { %v1611_v47 = vadd.f32 %v2373_v18, %v1610_v46  ;;  %2771 = vmatprep.mubr.msk.f32.mxu0 %vm267_vm2, %v1740_v42  ;;  %v1743_v49 = vmul.f32 %v1616_v44, %v1493_v27 }
0x1946   :  { %v2739_v33 = vpop.f32.mrf.mxu0  ;;  %2772 = vmatmul.mubr.msk.f32.gmra.mxu0 %vm267_vm2, %v1741_v43 }
0x1947   :  { %v1742_v48 = vmul.f32 %v1611_v47, %v1493_v27  ;;  %v1626_v50 = vadd.f32 %v2739_v33, %v2373_v18 }
0x1948   :  { %v1620_v51 = vpop.f32.mrf.mxu0 }
0x1949   :  { %v1621_v52 = vadd.f32 %v2373_v18, %v1620_v51  ;;  %2774 = vmatprep.mubr.msk.f32.mxu0 %vm267_vm2, %v1742_v48  ;;  %v1745_v9 = vmul.f32 %v1626_v50, %v1493_v27 }
0x194a   :  { %2775 = vmatmul.mubr.msk.f32.gmra.mxu0 %vm267_vm2, %v1743_v49 }
0x194b   :  { %v1744_v53 = vmul.f32 %v1621_v52, %v1493_v27 }
0x194d   :  { %2777 = vmatprep.mubr.msk.f32.mxu0 %vm267_vm2, %v1744_v53 }
0x194e   :  { %2778 = vmatmul.mubr.msk.f32.gmra.mxu0 %vm267_vm2, %v1745_v9 }
0x194f   :  { %2802 = vmatprep.mubr.msk.f32.mxu0 %vm3006_vm1, %v3005_v21 }
0x1a02   :  { %v2770_v56 = vpop.f32.mrf.mxu0 }
0x1a03   :  { %v1877_v7 = vsel %vm1875_vm4, %v2770_v56, -inf }
0x1a04   :  { %v1836_v57 = vpop.f32.mrf.mxu0 }
0x1a05   :  { %v1876_v62 = vsel %vm1875_vm4, %v1836_v57, -inf }
0x1a06   :  { %v2773_v58 = vpop.f32.mrf.mxu0 }
0x1a07   :  { %v1879_v54 = vsel %vm1875_vm4, %v2773_v58, -inf }
0x1a08   :  { %v1846_v14 = vpop.f32.mrf.mxu0 }
0x1a09   :  { %v1878_v39 = vsel %vm1875_vm4, %v1846_v14, -inf }
0x1a0a   :  { %v2776_v20 = vpop.f32.mrf.mxu0 }
0x1a0b   :  { %v1882_v63 = vsel %vm1875_vm4, %v2776_v20, -inf }
0x1a0c   :  { %v1856_v59 = vpop.f32.mrf.mxu0  ;;  %v1883_v36 = vmax.f32 %v1877_v7, %v1882_v63  ;;  %v63_v63 = vld [vmem:[#allocation4 + $0xe0] sm:$0xff]  ;;  %v72_v7 = vld [vmem:[#allocation4 + $0x128] sm:$0xff] }
0x1a0d   :  { %v1880_v22 = vsel %vm1875_vm4, %v1856_v59, -inf }
0x1a0e   :  { %v2779_v60 = vpop.f32.mrf.mxu0  ;;  %v1881_v24 = vmax.f32 %v1876_v62, %v1880_v22  ;;  %v64_v62 = vld [vmem:[#allocation4 + $0xe8] sm:$0xff] }
0x1a0f   :  { %v1886_v0 = vsel %vm1875_vm4, %v2779_v60, -inf  ;;  %2795 = vmatpush3.msra.mxu0 %v64_v62 }
0x1a10   :  { %v1866_v31 = vpop.f32.mrf.mxu0  ;;  %v1887_v35 = vmax.f32 %v1879_v54, %v1886_v0  ;;  %v1888_v45 = vmax.f32 %v1881_v24, %v1883_v36  ;;  %2796 = vmatprep.subr.mxu0 %v3005_v21  ;;  %v62_v0 = vld [vmem:[#allocation4 + $0xd8] sm:$0xff]  ;;  %v61_v24 = vld [vmem:[#allocation4 + $0xd0] sm:$0xff]  ;;  %v71_v54 = vld [vmem:[#allocation4 + $0x120] sm:$0xff] }
0x1a11   :  { %v1884_v1 = vsel %vm1875_vm4, %v1866_v31, -inf  ;;  %2797 = vmatpush3.msra.mxu0 %v63_v63 }
0x1a12   :  { %v1885_v61 = vmax.f32 %v1878_v39, %v1884_v1  ;;  %2798 = vmatprep.subr.mxu0 %v3005_v21  ;;  %v70_v39 = vld [vmem:[#allocation4 + $0x118] sm:$0xff]  ;;  %v2750_v1 = vpop.f32.mrf.mxu1 }
0x1a13   :  { %2799 = vmatpush3.msra.mxu0 %v62_v0 }
0x1a14   :  { %v1889_v2 = vmax.f32 %v1885_v61, %v1887_v35  ;;  %2800 = vmatprep.subr.mxu0 %v3005_v21  ;;  %v1699_v36 = vpop.f32.mrf.mxu1 }
0x1a15   :  { %2801 = vmatpush3.msra.mxu0 %v61_v24 }
0x1a16   :  { %v1890_v4 = vmax.f32 %v1888_v45, %v1889_v2  ;;  %2816 = vmatprep.subr.mxu0 %v3005_v21  ;;  %v2753_v35 = vpop.f32.mrf.mxu1 }
0x1a18   :  { %v1891_v6 = vsub.f32 %v1836_v57, %v1890_v4  ;;  %v1892_v8 = vsub.f32 %v2770_v56, %v1890_v4  ;;  %v1893_v10 = vsub.f32 %v1846_v14, %v1890_v4  ;;  %v1894_v11 = vsub.f32 %v2773_v58, %v1890_v4  ;;  %v1709_v61 = vpop.f32.mrf.mxu1 }
0x1a19   :  { %v1895_v12 = vsub.f32 %v1856_v59, %v1890_v4  ;;  %v1896_v5 = vsub.f32 %v2776_v20, %v1890_v4  ;;  %v1897_v3 = vsub.f32 %v1866_v31, %v1890_v4  ;;  %v1898_v18 = vsub.f32 %v2779_v60, %v1890_v4  ;;  %v73_v31 = vld [vmem:[#allocation4 + $0x130] sm:$0xff] }
0x1a1a   :  { %v1899_v13 = vmul.f32 1.442695, %v1891_v6  ;;  %v1901_v15 = vmul.f32 1.442695, %v1892_v8  ;;  %v1903_v16 = vmul.f32 1.442695, %v1893_v10  ;;  %v2756_v45 = vpop.f32.mrf.mxu1 }
0x1a1b   :  { %v1905_v40 = vmul.f32 1.442695, %v1894_v11  ;;  %v1907_v17 = vmul.f32 1.442695, %v1895_v12  ;;  %v1909_v19 = vmul.f32 1.442695, %v1896_v5 }
0x1a1c   :  { %2959 = vpow2.f32 %v1899_v13  ;;  %v1911_v23 = vmul.f32 1.442695, %v1897_v3  ;;  %v1913_v25 = vmul.f32 1.442695, %v1898_v18  ;;  %v1719_v2 = vpop.f32.mrf.mxu1  ;;  %v2382_v6 = vld [vmem:[%s3538_s2 + $0x4] ss:$0 sm:$0xff] }
0x1a1d   :  { %2961 = vpow2.f32 %v1901_v15  ;;  %v1705_v11 = vadd.f32 %v2750_v1, %v2382_v6  ;;  %v1700_v12 = vadd.f32 %v2382_v6, %v1699_v36  ;;  %v1710_v3 = vadd.f32 %v2382_v6, %v1709_v61 }
0x1a1e   :  { %2963 = vpow2.f32 %v1903_v16  ;;  %v2759_v4 = vpop.f32.mrf.mxu1 }
0x1a1f   :  { %2965 = vpow2.f32 %v1905_v40  ;;  %v1715_v40 = vadd.f32 %v2753_v35, %v2382_v6 }
0x1a20   :  { %2967 = vpow2.f32 %v1907_v17  ;;  %v1729_v8 = vpop.f32.mrf.mxu1 }
0x1a21   :  { %2969 = vpow2.f32 %v1909_v19 }
0x1a22   :  { %2971 = vpow2.f32 %v1911_v23 }
0x1a23   :  { %2973 = vpow2.f32 %v1913_v25 }
0x1a29   :  { %v2960_v26 = vpop.eup %2959 }
0x1a2a   :  { %v2962_v27 = vpop.eup %2961  ;;  %v1915_v37 = vsel %vm1875_vm4, %v2960_v26, 0.0 }
0x1a2b   :  { %v2964_v28 = vpop.eup %2963  ;;  %v1916_v29 = vsel %vm1875_vm4, %v2962_v27, 0.0 }
0x1a2c   :  { %v2966_v30 = vpop.eup %2965  ;;  %v1917_v32 = vadd.f32 %v1916_v29, %v1915_v37  ;;  %v1918_v34 = vsel %vm1875_vm4, %v2964_v28, 0.0  ;;  %v1725_v37 = vadd.f32 %v2756_v45, %v2382_v6 }
0x1a2d   :  { %v2968_v41 = vpop.eup %2967  ;;  %v1920_v42 = vsel %vm1875_vm4, %v2966_v30, 0.0 }
0x1a2e   :  { %v1919_v38 = vadd.f32 %v1918_v34, %v1917_v32  ;;  %v2970_v43 = vpop.eup %2969  ;;  %v1922_v46 = vsel %vm1875_vm4, %v2968_v41, 0.0 }
0x1a2f   :  { %v2972_v47 = vpop.eup %2971  ;;  %v1924_v48 = vsel %vm1875_vm4, %v2970_v43, 0.0 }
0x1a30   :  { %v1921_v44 = vadd.f32 %v1920_v42, %v1919_v38  ;;  %v2974_v49 = vpop.eup %2973  ;;  %v1926_v51 = vsel %vm1875_vm4, %v2972_v47, 0.0 }
0x1a31   :  { %v1928_v53 = vsel %vm1875_vm4, %v2974_v49, 0.0 }
0x1a32   :  { %v1923_v33 = vadd.f32 %v1922_v46, %v1921_v44  ;;  %v1735_v44 = vadd.f32 %v2759_v4, %v2382_v6  ;;  %v1730_v46 = vadd.f32 %v2382_v6, %v1729_v8 }
0x1a34   :  { %v1925_v50 = vadd.f32 %v1924_v48, %v1923_v33 }
0x1a36   :  { %v1927_v52 = vadd.f32 %v1926_v51, %v1925_v50 }
0x1a38   :  { %v1929_v9 = vadd.f32 %v1928_v53, %v1927_v52 }
0x1a3a   :  { %2975 = vrcp.f32 %v1929_v9 }
0x1a47   :  { %v2976_v55 = vpop.eup %2975 }
0x1a48   :  { %v1931_v56 = vmul.f32 %v2976_v55, %v2960_v26  ;;  %v1932_v57 = vmul.f32 %v2976_v55, %v2962_v27  ;;  %v1933_v58 = vmul.f32 %v2976_v55, %v2964_v28  ;;  %v1934_v14 = vmul.f32 %v2976_v55, %v2966_v30 }
0x1a49   :  { %v1935_v20 = vmul.f32 %v2976_v55, %v2968_v41  ;;  %v1936_v59 = vmul.f32 %v2976_v55, %v2970_v43  ;;  %v1937_v22 = vmul.f32 %v2976_v55, %v2972_v47  ;;  %v1938_v60 = vmul.f32 %v2976_v55, %v2974_v49 }
0x1a4a   :  { %2782 = vmatprep.mubr.msk.f32.mxu1 %vm1875_vm4, %v1931_v56  ;;  %v1720_v28 = vadd.f32 %v2382_v6, %v1719_v2 }
0x1a4b   :  { %2783 = vmatmul.mubr.msk.f32.vlgmr.msra.gmra.mxu1 %vm1875_vm4, %v1932_v57  ;;  %v2407_v57 = vld [vmem:[%s3538_s2 + $0x5] ss:$0 sm:$0xff] }
0x1a4c   :  { %2785 = vmatprep.mubr.msk.f32.mxu1 %vm1875_vm4, %v1933_v58  ;;  %2806 = vmatpush3.msra.mxu1 %v73_v31  ;;  %v2411_v31 = vld [vmem:[%s3538_s2 + $0x7] ss:$0 sm:$0xff] }
0x1a4d   :  { %2807 = vmatprep.subr.mxu1 %v3005_v21 }
0x1a4e   :  { %2808 = vmatpush3.msra.mxu1 %v72_v7 }
0x1a4f   :  { %2786 = vmatmul.mubr.msk.f32.gmra.mxu1 %vm1875_vm4, %v1934_v14  ;;  %2809 = vmatprep.subr.mxu1 %v3005_v21 }
0x1a50   :  { %2788 = vmatprep.mubr.msk.f32.mxu1 %vm1875_vm4, %v1935_v20  ;;  %2810 = vmatpush3.msra.mxu1 %v71_v54 }
0x1a51   :  { %2811 = vmatprep.subr.mxu1 %v3005_v21 }
0x1a52   :  { %2812 = vmatpush3.msra.mxu1 %v70_v39 }
0x1a53   :  { %2789 = vmatmul.mubr.msk.f32.gmra.mxu1 %vm1875_vm4, %v1936_v59  ;;  %v75_v59 = vld [vmem:[#allocation4 + $0x140] sm:$0xff] }
0x1a54   :  { %2791 = vmatprep.mubr.msk.f32.mxu1 %vm1875_vm4, %v1937_v22  ;;  %v74_v22 = vld [vmem:[#allocation4 + $0x138] sm:$0xff] }
0x1a57   :  { %2792 = vmatmul.mubr.msk.f32.gmra.mxu1 %vm1875_vm4, %v1938_v60  ;;  %v2409_v60 = vld [vmem:[%s3538_s2 + $0x6] ss:$0 sm:$0xff] }
0x1a58   :  { %2813 = vmatprep.mubr.msk.f32.mxu1 %vm3006_vm1, %v3005_v21 }
0x1b0b   :  { %v2784_v10 = vpop.f32.mrf.mxu1 }
0x1b0c   :  { %v2069_v15 = vmul.f32 %v2784_v10, %v1705_v11 }
0x1b0d   :  { %v2029_v13 = vpop.f32.mrf.mxu1 }
0x1b0e   :  { %v2068_v16 = vmul.f32 %v2029_v13, %v1700_v12  ;;  %v2077_v19 = vsel %vm267_vm2, %v2069_v15, 0.0 }
0x1b0f   :  { %v2787_v5 = vpop.f32.mrf.mxu1 }
0x1b10   :  { %v2076_v17 = vsel %vm267_vm2, %v2068_v16, 0.0  ;;  %v2071_v23 = vmul.f32 %v2787_v5, %v1715_v40 }
0x1b11   :  { %v2039_v18 = vpop.f32.mrf.mxu1  ;;  %v2078_v26 = vadd.f32 %v2077_v19, %v2076_v17 }
0x1b12   :  { %v2070_v25 = vmul.f32 %v2039_v18, %v1710_v3  ;;  %v2081_v34 = vsel %vm267_vm2, %v2071_v23, 0.0 }
0x1b13   :  { %v2790_v27 = vpop.f32.mrf.mxu1 }
0x1b14   :  { %v2079_v29 = vsel %vm267_vm2, %v2070_v25, 0.0  ;;  %v2073_v41 = vmul.f32 %v2790_v27, %v1725_v37 }
0x1b15   :  { %v2080_v30 = vadd.f32 %v2079_v29, %v2078_v26  ;;  %v2049_v32 = vpop.f32.mrf.mxu1 }
0x1b16   :  { %v2072_v38 = vmul.f32 %v2049_v32, %v1720_v28  ;;  %v2085_v49 = vsel %vm267_vm2, %v2073_v41, 0.0 }
0x1b17   :  { %v2082_v42 = vadd.f32 %v2081_v34, %v2080_v30  ;;  %v2793_v43 = vpop.f32.mrf.mxu1 }
0x1b18   :  { %v2083_v47 = vsel %vm267_vm2, %v2072_v38, 0.0  ;;  %v2075_v50 = vmul.f32 %v2793_v43, %v1735_v44 }
0x1b19   :  { %v2084_v33 = vadd.f32 %v2083_v47, %v2082_v42  ;;  %v2059_v48 = vpop.f32.mrf.mxu1 }
0x1b1a   :  { %v2074_v51 = vmul.f32 %v2059_v48, %v1730_v46  ;;  %v2089_v55 = vsel %vm267_vm2, %v2075_v50, 0.0 }
0x1b1b   :  { %v2086_v52 = vadd.f32 %v2085_v49, %v2084_v33 }
0x1b1c   :  { %v2087_v53 = vsel %vm267_vm2, %v2074_v51, 0.0 }
0x1b1d   :  { %v2088_v9 = vadd.f32 %v2087_v53, %v2086_v52 }
0x1b1f   :  { %v2090_v56 = vadd.f32 %v2089_v55, %v2088_v9 }
0x1b21   :  { %2803 = vmatmul.mubr.msk.f32.vlgmr.msra.gmra.mxu0 %vm267_vm2, %v2090_v56 }
0x1b22   :  { %2820 = vmatprep.mubr.msk.f32.mxu0 %vm3006_vm1, %v3005_v21  ;;  %2817 = vmatpush3.msra.mxu0 %v75_v59 }
0x1b23   :  { %2818 = vmatprep.subr.mxu0 %v3005_v21 }
0x1b24   :  { %2819 = vmatpush3.msra.mxu0 %v74_v22 }
0x1be1   :  { %v2164_v58 = vpop.f32.mrf.mxu0 }
0x1be2   :  { %v2165_v14 = vadd.f32 %v2407_v57, %v2164_v58 }
0x1be3   :  { %v2804_v20 = vpop.f32.mrf.mxu0 }
0x1be4   :  { %2814 = vmatmul.mubr.msk.f32.vlgmr.msra.gmra.mxu1 %vm267_vm2, %v2165_v14 }
0x1ca4   :  { %v2241_v62 = vpop.f32.mrf.mxu1 }
0x1ca5   :  { %v2242_v63 = vadd.f32 %v2409_v60, %v2241_v62 }
0x1ca6   :  { %v2815_v0 = vpop.f32.mrf.mxu1 }
0x1ca7   :  { %v2245_v24 = vmax.f32 %v2242_v63, 0.0 }
0x1ca9   :  { %2821 = vmatmul.mubr.msk.f32.vlgmr.msra.gmra.mxu0 %vm96_vm0, %v2245_v24 }
0x1d69   :  { %v2319_v7 = vpop.f32.mrf.mxu0 }
0x1d6a   :  { %v2320_v54 = vadd.f32 %v2411_v31, %v2319_v7 }
0x1d6b   :  { %v2822_v39 = vpop.f32.mrf.mxu0 }
0x1d6c   :  { %2323 = vst [vmem:[%s3539_s3] sm:$0xff] %v2320_v54 }
0x1d6d   :  { %2324 = vst.msk [vmem:[%s3539_s3] sm:$0xff] %vm267_vm2, %v2165_v14 }
0x1d6e   :  { %2329 = vsyncpa [#allocation5], 1 }

</bundles_post_ra>
